<compile_context>
chip_gen: v5e
topology: v5e:2x2
jax: 0.10.0
libtpu: 0.0.40
codegen_flags: <defaults>
</compile_context>

<pallas_src>
import jax
import jax.numpy as jnp
from jax.experimental import pallas as pl
from jax.experimental.pallas import tpu as pltpu

IGNORE_INDEX = -100
PAD_TOKEN_ID = 0

# ---- small synthetic config -------------------------------------------------
B = 2          # batch
S_IN = 8       # prompt length
S_GEN = 24     # "base generation" length (model_max_length stand-in)
S_WM = 20      # "watermarked generation" length (shorter, exercises F.pad path)
H = 32         # hidden size
V = 128        # vocab size


# =============================================================================
# Fused Pallas kernel: head forward + masked CE + two masked BCE reductions
# =============================================================================
def _fused_forward_loss_kernel(x_ref, gamma_ref, wlm_ref, wwm_ref,
                               ce_lbl_ref, gen_lbl_ref, disc_lbl_ref, out_ref):
    """x:        (N, H) f32   token hidden states for concat([base, wm]) rows
       gamma:    (1, H) f32   RMSNorm weight
       wlm:      (H, V) bf16  lm_head weight
       wwm:      (1, H) f32   watermark head weight (row vector)
       ce_lbl:   (N, 1) i32   per-row shifted CE label (IGNORE_INDEX where invalid)
       gen_lbl:  (N, 1) f32   generator-side BCE soft label (IGNORE_INDEX where invalid)
       disc_lbl: (N, 1) f32   discriminator-side BCE soft label (IGNORE_INDEX where invalid)
       out (SMEM, (1,8)): [ce_sum, ce_n, gen_bce_sum, gen_n, gen_match,
                           disc_bce_sum, disc_n, disc_match]
    """
    # ---- stand-in Llama head: RMSNorm (f32) + lm_head (bf16 MXU) ------------
    x = x_ref[...]
    ms = jnp.mean(x * x, axis=-1, keepdims=True)
    # TODO(synk): rms_norm_eps should come from the Llama config (1e-6 here).
    h = x * jax.lax.rsqrt(ms + 1e-6) * gamma_ref[...]
    logits = jnp.dot(h.astype(jnp.bfloat16), wlm_ref[...],
                     preferred_element_type=jnp.float32)          # (N, V) f32
    # watermark ("discriminator") head: single output column -> VPU reduction,
    # never stored to HBM.
    wm = jnp.sum(h * wwm_ref[...], axis=-1, keepdims=True)        # (N, 1) f32

    # ---- masked cross entropy (generator loss, base rows only via labels) ---
    ce_lbl = ce_lbl_ref[...]                                       # (N, 1) i32
    m = jnp.max(logits, axis=-1, keepdims=True)
    lse = m + jnp.log(jnp.sum(jnp.exp(logits - m), axis=-1, keepdims=True))
    col = jax.lax.broadcasted_iota(jnp.int32, logits.shape, 1)
    onehot = (col == ce_lbl).astype(jnp.float32)                   # 0 on IGNORE rows
    correct = jnp.sum(onehot * logits, axis=-1, keepdims=True)
    ce_valid = (ce_lbl != IGNORE_INDEX).astype(jnp.float32)
    out_ref[0, 0] = jnp.sum((lse - correct) * ce_valid)
    out_ref[0, 1] = jnp.sum(ce_valid)

    # ---- masked BCEWithLogits + accuracy (shared watermark logits) ----------
    def bce_acc(y):
        valid = (y != jnp.float32(IGNORE_INDEX)).astype(jnp.float32)
        yv = y * valid
        # stable BCEWithLogits: max(x,0) - x*y + log(1 + exp(-|x|))
        bce = jnp.maximum(wm, 0.0) - wm * yv + jnp.log(1.0 + jnp.exp(-jnp.abs(wm)))
        pred = (wm >= 0.0).astype(jnp.float32)
        lab = (yv >= 0.5).astype(jnp.float32)
        match = (pred == lab).astype(jnp.float32) * valid
        return jnp.sum(bce * valid), jnp.sum(valid), jnp.sum(match)

    g_sum, g_n, g_match = bce_acc(gen_lbl_ref[...])
    d_sum, d_n, d_match = bce_acc(disc_lbl_ref[...])
    out_ref[0, 2] = g_sum
    out_ref[0, 3] = g_n
    out_ref[0, 4] = g_match
    out_ref[0, 5] = d_sum
    out_ref[0, 6] = d_n
    out_ref[0, 7] = d_match


_VMEM = pl.BlockSpec(memory_space=pltpu.MemorySpace.VMEM)
_SMEM = pl.BlockSpec(memory_space=pltpu.MemorySpace.SMEM)


def fused_forward_losses(x_all, gamma, w_lm, w_wm, ce_labels, gen_labels, disc_labels):
    n = x_all.shape[0]
    cost = pl.CostEstimate(
        flops=2 * n * H * V + 12 * n * V + 16 * n * H,
        transcendentals=n * V + 6 * n,
        bytes_accessed=4 * n * H + 2 * H * V + 8 * H + 12 * n + 32,
    )
    # Single invocation (N=96, H=32, V=128 fit trivially in VMEM).  At realistic
    # H/V this would grow a vocab-tiling grid with bf16 tiles sized for the 64 MiB
    # v7x VMEM and dimension_semantics=("parallel", ...) for its 2 TensorCores.
    return pl.pallas_call(
        _fused_forward_loss_kernel,
        out_shape=jax.ShapeDtypeStruct((1, 8), jnp.float32),
        in_specs=[_VMEM] * 7,
        out_specs=_SMEM,
        cost_estimate=cost,
    )(x_all, gamma, w_lm, w_wm,
      ce_labels.reshape(-1, 1).astype(jnp.int32),
      gen_labels.reshape(-1, 1).astype(jnp.float32),
      disc_labels.reshape(-1, 1).astype(jnp.float32))


# =============================================================================
# AllInOneModel.forward (tensor math portion)
# =============================================================================
@jax.jit
def all_in_one_forward(params, input_ids, base_generation, wm_generation, key):
    input_length = input_ids.shape[-1]

    # --- masks / CE labels for the base ("generator") generation -------------
    attn_mask_base = base_generation != PAD_TOKEN_ID
    labels = jnp.where(
        (jnp.arange(base_generation.shape[-1])[None, :] < input_length)
        | (base_generation == PAD_TOKEN_ID),
        IGNORE_INDEX, base_generation)

    # --- pad base / wm generation to a common length (F.pad semantics) -------
    attn_mask_wm = wm_generation != PAD_TOKEN_ID
    diff = base_generation.shape[-1] - wm_generation.shape[-1]
    if diff > 0:
        wm_generation = jnp.pad(wm_generation, ((0, 0), (0, diff)),
                                constant_values=PAD_TOKEN_ID)
        attn_mask_wm = jnp.pad(attn_mask_wm, ((0, 0), (0, diff)),
                               constant_values=False)
    elif diff < 0:
        base_generation = jnp.pad(base_generation, ((0, 0), (0, -diff)),
                                  constant_values=PAD_TOKEN_ID)
        attn_mask_base = jnp.pad(attn_mask_base, ((0, 0), (0, -diff)),
                                 constant_values=False)
        labels = jnp.pad(labels, ((0, 0), (0, -diff)), constant_values=IGNORE_INDEX)

    b, s = base_generation.shape
    bw, sw = wm_generation.shape  # == (b, s) after padding

    # per-row shifted CE labels: row (bi, t) predicts labels[bi, t+1];
    # last position and all wm rows are IGNORE (identical pairing to
    # logits[:, :-1] vs labels[:, 1:] of the reference).
    ce_base = jnp.concatenate(
        [labels[:, 1:], jnp.full((b, 1), IGNORE_INDEX, labels.dtype)], axis=1)
    ce_labels = jnp.concatenate(
        [ce_base, jnp.full((bw, sw), IGNORE_INDEX, labels.dtype)], axis=0).reshape(-1)

    # --- random soft labels (same draws as the reference path) ---------------
    k1, k2, k3 = jax.random.split(key, 3)
    prefix = jnp.arange(s)[None, :] < input_length

    gen_disc = 1.0 - jax.random.uniform(k1, (b, s)) / 10.0
    gen_disc = jnp.where(attn_mask_base & ~prefix, gen_disc, float(IGNORE_INDEX))
    gen_labels = jnp.concatenate(
        [gen_disc, jnp.full((bw, sw), float(IGNORE_INDEX), jnp.float32)],
        axis=0).reshape(-1)

    base_lab = jax.random.uniform(k2, (b, s)) / 10.0
    base_lab = jnp.where(attn_mask_base & ~prefix, base_lab, float(IGNORE_INDEX))
    wm_lab = 1.0 - jax.random.uniform(k3, (bw, sw)) / 10.0
    wm_lab = jnp.where(attn_mask_wm & ~prefix, wm_lab, float(IGNORE_INDEX))
    disc_labels = jnp.concatenate([base_lab, wm_lab], axis=0).reshape(-1)

    # --- SINGLE forward over concat([base, wm]); base rows reused ------------
    all_generation = jnp.concatenate([base_generation, wm_generation], axis=0)
    tokens = all_generation.reshape(-1)
    # TODO(synk): at realistic hidden sizes, move this gather into the kernel via
    # PrefetchScalarGridSpec + pl.Element row-gather on the embedding table.
    x_all = jnp.take(params["embed"], tokens, axis=0)               # (2*b*s, H)

    sums = fused_forward_losses(x_all, params["gamma"], params["w_lm"],
                                params["w_wm"], ce_labels, gen_labels, disc_labels)

    def safe_div(num, den):                 # guard: all-IGNORE -> 0, not NaN
        return num / jnp.maximum(den, 1.0)

    generator_loss = safe_div(sums[0, 0], sums[0, 1])
    gen_discriminator_loss = safe_div(sums[0, 2], sums[0, 3])
    gen_discriminator_acc = safe_div(sums[0, 4], sums[0, 3])
    discriminator_loss = safe_div(sums[0, 5], sums[0, 6])
    discriminator_acc = safe_div(sums[0, 7], sums[0, 6])

    # fresh module => discriminator_stage is True => loss = discriminator_loss
    loss = discriminator_loss

    # TODO(synk): model.generate (beam search), tokenizer.batch_decode, LoRA adapter
    # enable/disable, Timer and acc_queue/stage bookkeeping are host-side control flow
    # with no Pallas equivalent.
    return {
        "loss": loss,
        "generator_loss": generator_loss,
        "gen_discriminator_loss": gen_discriminator_loss,
        "gen_discriminator_acc": gen_discriminator_acc,
        "discriminator_loss": discriminator_loss,
        "discriminator_acc": discriminator_acc,
    }


# =============================================================================
# main
# =============================================================================
if __name__ == "__main__":
    key = jax.random.PRNGKey(0)
    k_emb, k_g, k_lm, k_wm, k_in, k_base, k_wmgen, k_lbl = jax.random.split(key, 8)

    params = {
        "embed": 0.02 * jax.random.normal(k_emb, (V, H), jnp.float32),
        "gamma": jnp.ones((1, H), jnp.float32),
        # lm_head weight kept in bf16: MXU operand dtype, halves weight HBM/VMEM bytes
        "w_lm": (0.02 * jax.random.normal(k_lm, (H, V), jnp.float32)).astype(jnp.bfloat16),
        # watermark head as a lane-dense row vector (VPU reduction in-kernel)
        "w_wm": 0.02 * jax.random.normal(k_wm, (1, H), jnp.float32),
    }

    input_ids = jax.random.randint(k_in, (B, S_IN), 1, V, dtype=jnp.int32)

    # stand-ins for model.generate() outputs (autoregressive beam search not emulated)
    base_cont = jax.random.randint(k_base, (B, S_GEN - S_IN), 1, V, dtype=jnp.int32)
    base_generation = jnp.concatenate([input_ids, base_cont], axis=1)
    base_generation = base_generation.at[1, -3:].set(PAD_TOKEN_ID)   # some padding

    wm_cont = jax.random.randint(k_wmgen, (B, S_WM - S_IN), 1, V, dtype=jnp.int32)
    wm_generation = jnp.concatenate([input_ids, wm_cont], axis=1)
    wm_generation = wm_generation.at[0, -2:].set(PAD_TOKEN_ID)

    out = all_in_one_forward(params, input_ids, base_generation, wm_generation, k_lbl)
    out = jax.tree_util.tree_map(jax.block_until_ready, out)

    for v in out.values():
        assert jnp.isfinite(v), "non-finite output"
    print("KERNEL_OK")
</pallas_src>

<mosaic_0001>
module attributes {stable_mosaic.version = 11 : i64} {
  func.func @_fused_forward_loss_kernel(%arg0: memref<96x32xf32, #tpu.memory_space<vmem>>, %arg1: memref<1x32xf32, #tpu.memory_space<vmem>>, %arg2: memref<32x128xbf16, #tpu.memory_space<vmem>>, %arg3: memref<1x32xf32, #tpu.memory_space<vmem>>, %arg4: memref<96x1xi32, #tpu.memory_space<vmem>>, %arg5: memref<96x1xf32, #tpu.memory_space<vmem>>, %arg6: memref<96x1xf32, #tpu.memory_space<vmem>>, %arg7: memref<1x8xf32, #tpu.memory_space<smem>>) attributes {dimension_semantics = [], scalar_prefetch = 0 : i64, scratch_operands = 0 : i64, tpu.core_type = #tpu.core_type<tc>} {
    %c0 = arith.constant 0 : index
    %c0_0 = arith.constant 0 : index
    %0 = vector.load %arg0[%c0, %c0_0] : memref<96x32xf32, #tpu.memory_space<vmem>>, vector<96x32xf32>
    %1 = arith.mulf %0, %0 : vector<96x32xf32>
    %cst = arith.constant dense<0.000000e+00> : vector<96xf32>
    %2 = vector.multi_reduction <add>, %1, %cst [1] : vector<96x32xf32> to vector<96xf32>
    %3 = vector.shape_cast %2 : vector<96xf32> to vector<96x1xf32>
    %cst_1 = arith.constant 3.200000e+01 : f32
    %4 = vector.broadcast %cst_1 : f32 to vector<96x1xf32>
    %5 = arith.divf %3, %4 : vector<96x1xf32>
    %cst_2 = arith.constant 9.99999997E-7 : f32
    %6 = vector.broadcast %cst_2 : f32 to vector<96x1xf32>
    %7 = arith.addf %5, %6 : vector<96x1xf32>
    %8 = math.rsqrt %7 : vector<96x1xf32>
    %9 = vector.broadcast %8 : vector<96x1xf32> to vector<96x32xf32>
    %10 = arith.mulf %0, %9 : vector<96x32xf32>
    %c0_3 = arith.constant 0 : index
    %c0_4 = arith.constant 0 : index
    %11 = vector.load %arg1[%c0_3, %c0_4] : memref<1x32xf32, #tpu.memory_space<vmem>>, vector<1x32xf32>
    %12 = vector.broadcast %11 : vector<1x32xf32> to vector<96x32xf32>
    %13 = arith.mulf %10, %12 : vector<96x32xf32>
    %14 = arith.truncf %13 : vector<96x32xf32> to vector<96x32xbf16>
    %c0_5 = arith.constant 0 : index
    %c0_6 = arith.constant 0 : index
    %15 = vector.load %arg2[%c0_5, %c0_6] : memref<32x128xbf16, #tpu.memory_space<vmem>>, vector<32x128xbf16>
    %cst_7 = arith.constant dense<0.000000e+00> : vector<96x128xf32>
    %16 = tpu.matmul %14, %15, %cst_7 {dimension_numbers = #tpu.dot_dimension_numbers<[1], [0], [0], [1], [0, 0, 1, 1], [], []>} : vector<96x32xbf16>, vector<32x128xbf16>, vector<96x128xf32> -> vector<96x128xf32>
    %c0_8 = arith.constant 0 : index
    %c0_9 = arith.constant 0 : index
    %17 = vector.load %arg3[%c0_8, %c0_9] : memref<1x32xf32, #tpu.memory_space<vmem>>, vector<1x32xf32>
    %18 = vector.broadcast %17 : vector<1x32xf32> to vector<96x32xf32>
    %19 = arith.mulf %13, %18 : vector<96x32xf32>
    %cst_10 = arith.constant dense<0.000000e+00> : vector<96xf32>
    %20 = vector.multi_reduction <add>, %19, %cst_10 [1] : vector<96x32xf32> to vector<96xf32>
    %21 = vector.shape_cast %20 : vector<96xf32> to vector<96x1xf32>
    %c0_11 = arith.constant 0 : index
    %c0_12 = arith.constant 0 : index
    %22 = vector.load %arg4[%c0_11, %c0_12] : memref<96x1xi32, #tpu.memory_space<vmem>>, vector<96x1xi32>
    %cst_13 = arith.constant dense<0xFF800000> : vector<96xf32>
    %23 = vector.multi_reduction <maximumf>, %16, %cst_13 [1] : vector<96x128xf32> to vector<96xf32>
    %24 = vector.shape_cast %23 : vector<96xf32> to vector<96x1xf32>
    %25 = vector.broadcast %24 : vector<96x1xf32> to vector<96x128xf32>
    %26 = arith.subf %16, %25 : vector<96x128xf32>
    %27 = math.exp %26 : vector<96x128xf32>
    %cst_14 = arith.constant dense<0.000000e+00> : vector<96xf32>
    %28 = vector.multi_reduction <add>, %27, %cst_14 [1] : vector<96x128xf32> to vector<96xf32>
    %29 = vector.shape_cast %28 : vector<96xf32> to vector<96x1xf32>
    %30 = math.log %29 : vector<96x1xf32>
    %31 = arith.addf %24, %30 : vector<96x1xf32>
    %32 = tpu.iota {dimensions = array<i32: 1>} : vector<96x128xi32>
    %33 = vector.broadcast %22 : vector<96x1xi32> to vector<96x128xi32>
    %34 = arith.cmpi eq, %32, %33 : vector<96x128xi32>
    %35 = arith.extui %34 : vector<96x128xi1> to vector<96x128xi32>
    %36 = arith.sitofp %35 : vector<96x128xi32> to vector<96x128xf32>
    %37 = arith.mulf %36, %16 : vector<96x128xf32>
    %cst_15 = arith.constant dense<0.000000e+00> : vector<96xf32>
    %38 = vector.multi_reduction <add>, %37, %cst_15 [1] : vector<96x128xf32> to vector<96xf32>
    %39 = vector.shape_cast %38 : vector<96xf32> to vector<96x1xf32>
    %c-100_i32 = arith.constant -100 : i32
    %40 = vector.broadcast %c-100_i32 : i32 to vector<96x1xi32>
    %41 = arith.cmpi ne, %22, %40 : vector<96x1xi32>
    %42 = arith.extui %41 : vector<96x1xi1> to vector<96x1xi32>
    %43 = arith.sitofp %42 : vector<96x1xi32> to vector<96x1xf32>
    %44 = arith.subf %31, %39 : vector<96x1xf32>
    %45 = arith.mulf %44, %43 : vector<96x1xf32>
    %46 = vector.shape_cast %45 : vector<96x1xf32> to vector<1x96x1xf32>
    %cst_16 = arith.constant dense<0.000000e+00> : vector<1xf32>
    %47 = vector.multi_reduction <add>, %46, %cst_16 [1, 2] : vector<1x96x1xf32> to vector<1xf32>
    %48 = vector.shape_cast %47 : vector<1xf32> to vector<1x1x1xf32>
    %49 = vector.extract %48[0, 0, 0] : f32 from vector<1x1x1xf32>
    %c0_17 = arith.constant 0 : index
    %c0_18 = arith.constant 0 : index
    %50 = memref.load %arg7[%c0_17, %c0_18] : memref<1x8xf32, #tpu.memory_space<smem>>
    memref.store %49, %arg7[%c0_17, %c0_18] : memref<1x8xf32, #tpu.memory_space<smem>>
    %51 = vector.shape_cast %43 : vector<96x1xf32> to vector<1x96x1xf32>
    %cst_19 = arith.constant dense<0.000000e+00> : vector<1xf32>
    %52 = vector.multi_reduction <add>, %51, %cst_19 [1, 2] : vector<1x96x1xf32> to vector<1xf32>
    %53 = vector.shape_cast %52 : vector<1xf32> to vector<1x1x1xf32>
    %54 = vector.extract %53[0, 0, 0] : f32 from vector<1x1x1xf32>
    %c0_20 = arith.constant 0 : index
    %c1 = arith.constant 1 : index
    %55 = memref.load %arg7[%c0_20, %c1] : memref<1x8xf32, #tpu.memory_space<smem>>
    memref.store %54, %arg7[%c0_20, %c1] : memref<1x8xf32, #tpu.memory_space<smem>>
    %c0_21 = arith.constant 0 : index
    %c0_22 = arith.constant 0 : index
    %56 = vector.load %arg5[%c0_21, %c0_22] : memref<96x1xf32, #tpu.memory_space<vmem>>, vector<96x1xf32>
    %cst_23 = arith.constant -1.000000e+02 : f32
    %57 = vector.broadcast %cst_23 : f32 to vector<96x1xf32>
    %58 = arith.cmpf one, %56, %57 : vector<96x1xf32>
    %59 = arith.extui %58 : vector<96x1xi1> to vector<96x1xi32>
    %60 = arith.sitofp %59 : vector<96x1xi32> to vector<96x1xf32>
    %61 = arith.mulf %56, %60 : vector<96x1xf32>
    %cst_24 = arith.constant 0.000000e+00 : f32
    %62 = vector.broadcast %cst_24 : f32 to vector<96x1xf32>
    %63 = arith.maximumf %21, %62 : vector<96x1xf32>
    %64 = arith.mulf %21, %61 : vector<96x1xf32>
    %65 = arith.subf %63, %64 : vector<96x1xf32>
    %66 = math.absf %21 : vector<96x1xf32>
    %cst_25 = arith.constant 0.000000e+00 : f32
    %67 = vector.broadcast %cst_25 : f32 to vector<96x1xf32>
    %68 = arith.subf %67, %66 : vector<96x1xf32>
    %69 = math.exp %68 : vector<96x1xf32>
    %cst_26 = arith.constant 1.000000e+00 : f32
    %70 = vector.broadcast %cst_26 : f32 to vector<96x1xf32>
    %71 = arith.addf %70, %69 : vector<96x1xf32>
    %72 = math.log %71 : vector<96x1xf32>
    %73 = arith.addf %65, %72 : vector<96x1xf32>
    %cst_27 = arith.constant 0.000000e+00 : f32
    %74 = vector.broadcast %cst_27 : f32 to vector<96x1xf32>
    %75 = arith.cmpf oge, %21, %74 : vector<96x1xf32>
    %76 = arith.extui %75 : vector<96x1xi1> to vector<96x1xi32>
    %77 = arith.sitofp %76 : vector<96x1xi32> to vector<96x1xf32>
    %cst_28 = arith.constant 5.000000e-01 : f32
    %78 = vector.broadcast %cst_28 : f32 to vector<96x1xf32>
    %79 = arith.cmpf oge, %61, %78 : vector<96x1xf32>
    %80 = arith.extui %79 : vector<96x1xi1> to vector<96x1xi32>
    %81 = arith.sitofp %80 : vector<96x1xi32> to vector<96x1xf32>
    %82 = arith.cmpf oeq, %77, %81 : vector<96x1xf32>
    %83 = arith.extui %82 : vector<96x1xi1> to vector<96x1xi32>
    %84 = arith.sitofp %83 : vector<96x1xi32> to vector<96x1xf32>
    %85 = arith.mulf %84, %60 : vector<96x1xf32>
    %86 = arith.mulf %73, %60 : vector<96x1xf32>
    %87 = vector.shape_cast %86 : vector<96x1xf32> to vector<1x96x1xf32>
    %cst_29 = arith.constant dense<0.000000e+00> : vector<1xf32>
    %88 = vector.multi_reduction <add>, %87, %cst_29 [1, 2] : vector<1x96x1xf32> to vector<1xf32>
    %89 = vector.shape_cast %88 : vector<1xf32> to vector<1x1x1xf32>
    %90 = vector.extract %89[0, 0, 0] : f32 from vector<1x1x1xf32>
    %91 = vector.shape_cast %60 : vector<96x1xf32> to vector<1x96x1xf32>
    %cst_30 = arith.constant dense<0.000000e+00> : vector<1xf32>
    %92 = vector.multi_reduction <add>, %91, %cst_30 [1, 2] : vector<1x96x1xf32> to vector<1xf32>
    %93 = vector.shape_cast %92 : vector<1xf32> to vector<1x1x1xf32>
    %94 = vector.extract %93[0, 0, 0] : f32 from vector<1x1x1xf32>
    %95 = vector.shape_cast %85 : vector<96x1xf32> to vector<1x96x1xf32>
    %cst_31 = arith.constant dense<0.000000e+00> : vector<1xf32>
    %96 = vector.multi_reduction <add>, %95, %cst_31 [1, 2] : vector<1x96x1xf32> to vector<1xf32>
    %97 = vector.shape_cast %96 : vector<1xf32> to vector<1x1x1xf32>
    %98 = vector.extract %97[0, 0, 0] : f32 from vector<1x1x1xf32>
    %c0_32 = arith.constant 0 : index
    %c0_33 = arith.constant 0 : index
    %99 = vector.load %arg6[%c0_32, %c0_33] : memref<96x1xf32, #tpu.memory_space<vmem>>, vector<96x1xf32>
    %cst_34 = arith.constant -1.000000e+02 : f32
    %100 = vector.broadcast %cst_34 : f32 to vector<96x1xf32>
    %101 = arith.cmpf one, %99, %100 : vector<96x1xf32>
    %102 = arith.extui %101 : vector<96x1xi1> to vector<96x1xi32>
    %103 = arith.sitofp %102 : vector<96x1xi32> to vector<96x1xf32>
    %104 = arith.mulf %99, %103 : vector<96x1xf32>
    %cst_35 = arith.constant 0.000000e+00 : f32
    %105 = vector.broadcast %cst_35 : f32 to vector<96x1xf32>
    %106 = arith.maximumf %21, %105 : vector<96x1xf32>
    %107 = arith.mulf %21, %104 : vector<96x1xf32>
    %108 = arith.subf %106, %107 : vector<96x1xf32>
    %109 = math.absf %21 : vector<96x1xf32>
    %cst_36 = arith.constant 0.000000e+00 : f32
    %110 = vector.broadcast %cst_36 : f32 to vector<96x1xf32>
    %111 = arith.subf %110, %109 : vector<96x1xf32>
    %112 = math.exp %111 : vector<96x1xf32>
    %cst_37 = arith.constant 1.000000e+00 : f32
    %113 = vector.broadcast %cst_37 : f32 to vector<96x1xf32>
    %114 = arith.addf %113, %112 : vector<96x1xf32>
    %115 = math.log %114 : vector<96x1xf32>
    %116 = arith.addf %108, %115 : vector<96x1xf32>
    %cst_38 = arith.constant 0.000000e+00 : f32
    %117 = vector.broadcast %cst_38 : f32 to vector<96x1xf32>
    %118 = arith.cmpf oge, %21, %117 : vector<96x1xf32>
    %119 = arith.extui %118 : vector<96x1xi1> to vector<96x1xi32>
    %120 = arith.sitofp %119 : vector<96x1xi32> to vector<96x1xf32>
    %cst_39 = arith.constant 5.000000e-01 : f32
    %121 = vector.broadcast %cst_39 : f32 to vector<96x1xf32>
    %122 = arith.cmpf oge, %104, %121 : vector<96x1xf32>
    %123 = arith.extui %122 : vector<96x1xi1> to vector<96x1xi32>
    %124 = arith.sitofp %123 : vector<96x1xi32> to vector<96x1xf32>
    %125 = arith.cmpf oeq, %120, %124 : vector<96x1xf32>
    %126 = arith.extui %125 : vector<96x1xi1> to vector<96x1xi32>
    %127 = arith.sitofp %126 : vector<96x1xi32> to vector<96x1xf32>
    %128 = arith.mulf %127, %103 : vector<96x1xf32>
    %129 = arith.mulf %116, %103 : vector<96x1xf32>
    %130 = vector.shape_cast %129 : vector<96x1xf32> to vector<1x96x1xf32>
    %cst_40 = arith.constant dense<0.000000e+00> : vector<1xf32>
    %131 = vector.multi_reduction <add>, %130, %cst_40 [1, 2] : vector<1x96x1xf32> to vector<1xf32>
    %132 = vector.shape_cast %131 : vector<1xf32> to vector<1x1x1xf32>
    %133 = vector.extract %132[0, 0, 0] : f32 from vector<1x1x1xf32>
    %134 = vector.shape_cast %103 : vector<96x1xf32> to vector<1x96x1xf32>
    %cst_41 = arith.constant dense<0.000000e+00> : vector<1xf32>
    %135 = vector.multi_reduction <add>, %134, %cst_41 [1, 2] : vector<1x96x1xf32> to vector<1xf32>
    %136 = vector.shape_cast %135 : vector<1xf32> to vector<1x1x1xf32>
    %137 = vector.extract %136[0, 0, 0] : f32 from vector<1x1x1xf32>
    %138 = vector.shape_cast %128 : vector<96x1xf32> to vector<1x96x1xf32>
    %cst_42 = arith.constant dense<0.000000e+00> : vector<1xf32>
    %139 = vector.multi_reduction <add>, %138, %cst_42 [1, 2] : vector<1x96x1xf32> to vector<1xf32>
    %140 = vector.shape_cast %139 : vector<1xf32> to vector<1x1x1xf32>
    %141 = vector.extract %140[0, 0, 0] : f32 from vector<1x1x1xf32>
    %c0_43 = arith.constant 0 : index
    %c2 = arith.constant 2 : index
    %142 = memref.load %arg7[%c0_43, %c2] : memref<1x8xf32, #tpu.memory_space<smem>>
    memref.store %90, %arg7[%c0_43, %c2] : memref<1x8xf32, #tpu.memory_space<smem>>
    %c0_44 = arith.constant 0 : index
    %c3 = arith.constant 3 : index
    %143 = memref.load %arg7[%c0_44, %c3] : memref<1x8xf32, #tpu.memory_space<smem>>
    memref.store %94, %arg7[%c0_44, %c3] : memref<1x8xf32, #tpu.memory_space<smem>>
    %c0_45 = arith.constant 0 : index
    %c4 = arith.constant 4 : index
    %144 = memref.load %arg7[%c0_45, %c4] : memref<1x8xf32, #tpu.memory_space<smem>>
    memref.store %98, %arg7[%c0_45, %c4] : memref<1x8xf32, #tpu.memory_space<smem>>
    %c0_46 = arith.constant 0 : index
    %c5 = arith.constant 5 : index
    %145 = memref.load %arg7[%c0_46, %c5] : memref<1x8xf32, #tpu.memory_space<smem>>
    memref.store %133, %arg7[%c0_46, %c5] : memref<1x8xf32, #tpu.memory_space<smem>>
    %c0_47 = arith.constant 0 : index
    %c6 = arith.constant 6 : index
    %146 = memref.load %arg7[%c0_47, %c6] : memref<1x8xf32, #tpu.memory_space<smem>>
    memref.store %137, %arg7[%c0_47, %c6] : memref<1x8xf32, #tpu.memory_space<smem>>
    %c0_48 = arith.constant 0 : index
    %c7 = arith.constant 7 : index
    %147 = memref.load %arg7[%c0_48, %c7] : memref<1x8xf32, #tpu.memory_space<smem>>
    memref.store %141, %arg7[%c0_48, %c7] : memref<1x8xf32, #tpu.memory_space<smem>>
    return
  }
}

</mosaic_0001>

<bundles_post_ra>
// kernel: all_in_one_forward.3
= control target key start
LH: loop header
LB: loop body
LE: loop exit
PB: predicated region body
PF: predicated region fallthrough
CT: control target
= control target key end

     0   :  { %vm52_vm0 = vcmask 261120   ;;  %v1808_v6 = vmov 0   ;;  %s3356_s0 = inlined_call_operand.vmem [shape: f32[96,32], index: 0, kind: input, shape index: {}]   ;;  %s3357_s1 = inlined_call_operand.vmem [shape: f32[1,32], index: 1, kind: input, shape index: {}]   ;;  %s3358_s2 = inlined_call_operand.vmem [shape: bf16[32,128], index: 2, kind: input, shape index: {}]   ;;  %s3359_s3 = inlined_call_operand.vmem [shape: f32[1,32], index: 3, kind: input, shape index: {}]   ;;  %s3360_s4 = inlined_call_operand.vmem [shape: s32[96,1], index: 4, kind: input, shape index: {}]   ;;  %s3361_s5 = inlined_call_operand.vmem [shape: f32[96,1], index: 5, kind: input, shape index: {}]   ;;  %s3362_s6 = inlined_call_operand.vmem [shape: f32[96,1], index: 6, kind: input, shape index: {}]   ;;  %s3363_s7 = inlined_call_operand.vmem [shape: f32[1,8], index: 7, kind: output, shape index: {}]  }
   0x1   :  { %v1855_v0 = vld [vmem:[%s3356_s0 + $0x30] sm:$0xff]  ;;  %v1865_v2 = vld [vmem:[%s3356_s0] sm:$0xff]  ;;  %1655 = vset.pattern.permute.xlu2 %v1808_v6  ;;  %1656 = vset.pattern.permute.xlu0 %v1808_v6  ;;  %v1876_v7 = vld [vmem:[%s3356_s0 + $0x38] sm:$0xff] }
   0x2   :  { %v1860_v1 = vld [vmem:[%s3356_s0 + $0x10] sm:$0xff]  ;;  %v46_v3 = vmul.f32 %v1855_v0, %v1855_v0  ;;  %v40_v5 = vmul.f32 %v1865_v2, %v1865_v2  ;;  %v1881_v8 = vld [vmem:[%s3356_s0 + $0x18] sm:$0xff]  ;;  %1657 = vset.pattern.permute.xlu1 %v1808_v6  ;;  %v1889_v12 = vld [vmem:[%s3356_s0 + $0x8] sm:$0xff]  ;;  %v47_v13 = vmul.f32 %v1876_v7, %v1876_v7 }
   0x3   :  { %v42_v4 = vmul.f32 %v1860_v1, %v1860_v1  ;;  %v43_v14 = vmul.f32 %v1881_v8, %v1881_v8 }
   0x4   :  { %v71_v9 = vsel %vm52_vm0, %v46_v3, 0.0  ;;  %v53_v11 = vsel %vm52_vm0, %v40_v5, 0.0 }
   0x5   :  { %v59_v10 = vsel %vm52_vm0, %v42_v4, 0.0  ;;  %72 = vadd.xlane.f32.xlu1 %v71_v9  ;;  %54 = vadd.xlane.f32.xlu2 %v53_v11 }
   0x6   :  { %60 = vadd.xlane.f32.xlu0 %v59_v10 }
   0x7   :  { %12 = vsyncpa [#allocation3], 0  ;;  %v41_v15 = vmul.f32 %v1889_v12, %v1889_v12  ;;  %v74_v16 = vsel %vm52_vm0, %v47_v13, 0.0  ;;  %v62_v17 = vsel %vm52_vm0, %v43_v14, 0.0  ;;  %v1903_v19 = vld [vmem:[%s3356_s0 + $0x28] sm:$0xff]  ;;  %v1908_v20 = vld [vmem:[%s3356_s0 + $0x20] sm:$0xff] }
   0x8   :  { %v1913_v21 = vld [vmem:[%s3356_s0 + $0x40] sm:$0xff]  ;;  %v45_v22 = vmul.f32 %v1903_v19, %v1903_v19  ;;  %v44_v23 = vmul.f32 %v1908_v20, %v1908_v20  ;;  %v1927_v28 = vld [vmem:[%s3356_s0 + $0x50] sm:$0xff]  ;;  %v1932_v29 = vld [vmem:[%s3356_s0 + $0x48] sm:$0xff]  ;;  %v1809_v49 = vmov 32.0   ;;  %s1495_s24 = sshll.u32 %s3363_s7, 4  ;;  %s1811_s29 = smov [#allocation2]   ;;  %s1496_s24 = int_to_ptr.vmem [resolvable:$true] %s1495_s24 }
   0x9   :  { %v56_v18 = vsel %vm52_vm0, %v41_v15, 0.0  ;;  %v48_v24 = vmul.f32 %v1913_v21, %v1913_v21  ;;  %v1937_v30 = vld [vmem:[%s3356_s0 + $0x58] sm:$0xff]  ;;  %v50_v31 = vmul.f32 %v1927_v28, %v1927_v28  ;;  %v49_v32 = vmul.f32 %v1932_v29, %v1932_v29  ;;  %v400_v37 = vld [vmem:[%s3360_s4 + $0x8] sm:$0xff]  ;;  %v399_v38 = vld [vmem:[%s3360_s4] sm:$0xff] }
   0xa   :  { %v68_v25 = vsel %vm52_vm0, %v45_v22, 0.0  ;;  %v65_v26 = vsel %vm52_vm0, %v44_v23, 0.0  ;;  %v51_v33 = vmul.f32 %v1937_v30, %v1937_v30  ;;  %v401_v39 = vld [vmem:[%s3360_s4 + $0x10] sm:$0xff]  ;;  %v406_v40 = vld [vmem:[%s3360_s4 + $0x38] sm:$0xff]  ;;  %v403_v44 = vld [vmem:[%s3360_s4 + $0x20] sm:$0xff]  ;;  %1660 = vrcp.f32 %v1809_v49 }
   0xb   :  { %v77_v27 = vsel %vm52_vm0, %v48_v24, 0.0  ;;  %v83_v34 = vsel %vm52_vm0, %v50_v31, 0.0  ;;  %v80_v35 = vsel %vm52_vm0, %v49_v32, 0.0  ;;  %v402_v41 = vld [vmem:[%s3360_s4 + $0x18] sm:$0xff]  ;;  %v405_v42 = vld [vmem:[%s3360_s4 + $0x30] sm:$0xff]  ;;  %v408_v45 = vld [vmem:[%s3360_s4 + $0x48] sm:$0xff] }
   0xc   :  { %v86_v36 = vsel %vm52_vm0, %v51_v33, 0.0  ;;  %v409_v43 = vld [vmem:[%s3360_s4 + $0x50] sm:$0xff]  ;;  %v404_v46 = vld [vmem:[%s3360_s4 + $0x28] sm:$0xff]  ;;  %v407_v47 = vld [vmem:[%s3360_s4 + $0x40] sm:$0xff] }
   0xd   :  { %75 = vadd.xlane.f32.xlu1 %v74_v16  ;;  %57 = vadd.xlane.f32.xlu2 %v56_v18  ;;  %v410_v48 = vld [vmem:[%s3360_s4 + $0x58] sm:$0xff]  ;;  %v1628_v61 = vld [vmem:[%s3358_s2 + $0x8] sm:$0xff]  ;;  %v1627_v23 = vld [vmem:[%s3358_s2] sm:$0xff] }
   0xe   :  { %63 = vadd.xlane.f32.xlu0 %v62_v17  ;;  %314 = vmatpush.bf16.msra.mxu0 %v1628_v61 }
   0xf   :  { %1629 = vmatpush.bf16.msra.mxu1 %v1628_v61  ;;  %1630 = vmatpush.bf16.msra.mxu2 %v1628_v61 }
  0x10   :  { %v1661_v50 = vpop.eup %1660  ;;  %1631 = vmatpush.bf16.msra.mxu3 %v1628_v61 }
  0x11   :  { %v90_v51 = vmul.f32 32.0, %v1661_v50  ;;  %vm94_vm1 = vweird.f32 %v1661_v50 }
  0x12   :  { %315 = vmatpush.bf16.msra.mxu0 %v1627_v23 }
  0x13   :  { %v91_v52 = vsub.f32 1.0, %v90_v51  ;;  %1632 = vmatpush.bf16.msra.mxu1 %v1627_v23  ;;  %1633 = vmatpush.bf16.msra.mxu2 %v1627_v23 }
  0x14   :  { %1634 = vmatpush.bf16.msra.mxu3 %v1627_v23 }
  0x15   :  { %69 = vadd.xlane.f32.xlu1 %v68_v25  ;;  %78 = vadd.xlane.f32.xlu2 %v77_v27  ;;  %v92_v53 = vmul.f32 %v1661_v50, %v91_v52 }
  0x16   :  { %66 = vadd.xlane.f32.xlu0 %v65_v26 }
  0x17   :  { %v93_v54 = vadd.f32 %v1661_v50, %v92_v53 }
  0x19   :  { %v1984_v55 = vsel %vm94_vm1, %v1661_v50, %v93_v54 }
  0x1d   :  { %84 = vadd.xlane.f32.xlu1 %v83_v34  ;;  %87 = vadd.xlane.f32.xlu2 %v86_v36 }
  0x1e   :  { %81 = vadd.xlane.f32.xlu0 %v80_v35 }
  0x32   :  { %537 = vperm.xlu0 %1656, %v400_v37  }
  0x35   :  { %534 = vperm.xlu2 %1655, %v399_v38  }
  0x36   :  { %540 = vperm.xlu1 %1657, %v401_v39  }
  0x3a   :  { %555 = vperm.xlu0 %1656, %v406_v40  }
  0x3d   :  { %543 = vperm.xlu2 %1655, %v402_v41  }
  0x3e   :  { %552 = vperm.xlu1 %1657, %v405_v42  }
  0x42   :  { %564 = vperm.xlu0 %1656, %v409_v43  }
  0x45   :  { %546 = vperm.xlu2 %1655, %v403_v44  }
  0x46   :  { %561 = vperm.xlu1 %1657, %v408_v45  }
  0x4d   :  { %549 = vperm.xlu2 %1655, %v404_v46  }
  0x55   :  { %558 = vperm.xlu2 %1655, %v407_v47  }
  0x5d   :  { %567 = vperm.xlu2 %1655, %v410_v48  }
  0x78   :  { %v73_v56 = vpop.xlane.xlu1 %72  ;;  %v55_v60 = vpop.xlane.xlu2 %54 }
  0x79   :  { %v61_v57 = vpop.xlane.xlu0 %60  ;;  %v102_v58 = vmul.f32 %v1984_v55, %v73_v56  ;;  %v96_v62 = vmul.f32 %v1984_v55, %v55_v60 }
  0x7a   :  { %v98_v59 = vmul.f32 %v1984_v55, %v61_v57 }
  0x7b   :  { %v1992_v63 = vadd.f32 1e-06, %v102_v58  ;;  %v1996_v4 = vadd.f32 1e-06, %v96_v62 }
  0x7c   :  { %v1994_v3 = vadd.f32 1e-06, %v98_v59 }
  0x7d   :  { %1662 = vrsqrt.f32 %v1992_v63  ;;  %vm186_vm3 = vweird.f32 %v1992_v63  ;;  %vm126_vm10 = vweird.f32 %v1996_v4 }
  0x7e   :  { %1664 = vrsqrt.f32 %v1994_v3  ;;  %vm146_vm2 = vweird.f32 %v1994_v3 }
  0x7f   :  { %1666 = vrsqrt.f32 %v1996_v4 }
  0x80   :  { %v76_v5 = vpop.xlane.xlu1 %75  ;;  %v58_v11 = vpop.xlane.xlu2 %57 }
  0x81   :  { %v64_v6 = vpop.xlane.xlu0 %63  ;;  %v103_v9 = vmul.f32 %v1984_v55, %v76_v5  ;;  %v97_v13 = vmul.f32 %v1984_v55, %v58_v11 }
  0x82   :  { %v99_v10 = vmul.f32 %v1984_v55, %v64_v6 }
  0x83   :  { %v2004_v14 = vpop.eup %1662  ;;  %v2006_v15 = vadd.f32 1e-06, %v103_v9  ;;  %v2014_v22 = vadd.f32 1e-06, %v97_v13 }
  0x84   :  { %v2008_v16 = vadd.f32 1e-06, %v99_v10  ;;  %v2010_v17 = vpop.eup %1664  ;;  %v181_v18 = vmul.f32 %v2004_v14, %v1992_v63  ;;  %vm187_vm4 = vweird.f32 %v2004_v14 }
  0x85   :  { %v2019_v24 = vpop.eup %1666  ;;  %v141_v25 = vmul.f32 %v2010_v17, %v1994_v3  ;;  %1668 = vrsqrt.f32 %v2006_v15  ;;  %vm147_vm5 = vweird.f32 %v2010_v17  ;;  %vm196_vm8 = vweird.f32 %v2006_v15  ;;  %vm2099_vm15 = vmor %vm186_vm3, %vm187_vm4 }
  0x86   :  { %v182_v26 = vmul.f32 %v2004_v14, %v181_v18  ;;  %v121_v27 = vmul.f32 %v2019_v24, %v1996_v4  ;;  %1670 = vrsqrt.f32 %v2008_v16  ;;  %vm127_vm6 = vweird.f32 %v2019_v24  ;;  %vm2076_vm11 = vmor %vm146_vm2, %vm147_vm5  ;;  %v2183_v4 = vld [vmem:[%s3359_s3] ss:$0 sm:$0xff] }
  0x87   :  { %v142_v31 = vmul.f32 %v2010_v17, %v141_v25  ;;  %1672 = vrsqrt.f32 %v2014_v22  ;;  %vm156_vm7 = vweird.f32 %v2008_v16  ;;  %vm136_vm9 = vweird.f32 %v2014_v22 }
  0x88   :  { %v183_v32 = vmul.f32 0.5, %v182_v26  ;;  %v122_v33 = vmul.f32 %v2019_v24, %v121_v27  ;;  %v70_v34 = vpop.xlane.xlu1 %69  ;;  %v79_v39 = vpop.xlane.xlu2 %78 }
  0x89   :  { %v67_v35 = vpop.xlane.xlu0 %66  ;;  %v143_v36 = vmul.f32 0.5, %v142_v31  ;;  %v101_v37 = vmul.f32 %v1984_v55, %v70_v34  ;;  %v104_v47 = vmul.f32 %v1984_v55, %v79_v39 }
  0x8a   :  { %v100_v38 = vmul.f32 %v1984_v55, %v67_v35  ;;  %v184_v41 = vsub.f32 1.5, %v183_v32  ;;  %v123_v45 = vmul.f32 0.5, %v122_v33 }
  0x8b   :  { %v2033_v40 = vpop.eup %1668  ;;  %v2036_v42 = vadd.f32 1e-06, %v101_v37  ;;  %v144_v49 = vsub.f32 1.5, %v143_v36  ;;  %v2067_v59 = vadd.f32 1e-06, %v104_v47 }
  0x8c   :  { %v2038_v43 = vadd.f32 1e-06, %v100_v38  ;;  %v2040_v44 = vpop.eup %1670  ;;  %v191_v46 = vmul.f32 %v2033_v40, %v2006_v15  ;;  %v2059_v53 = vmul.f32 %v2004_v14, %v184_v41  ;;  %v124_v56 = vsub.f32 1.5, %v123_v45 }
  0x8d   :  { %v2047_v48 = vpop.eup %1672  ;;  %v151_v50 = vmul.f32 %v2040_v44, %v2008_v16  ;;  %1674 = vrsqrt.f32 %v2036_v42  ;;  %v145_v62 = vmul.f32 %v2010_v17, %v144_v49  ;;  %vm157_vm12 = vweird.f32 %v2040_v44 }
  0x8e   :  { %v192_v51 = vmul.f32 %v2033_v40, %v191_v46  ;;  %v131_v52 = vmul.f32 %v2047_v48, %v2014_v22  ;;  %1676 = vrsqrt.f32 %v2038_v43  ;;  %vm197_vm13 = vweird.f32 %v2033_v40  ;;  %vm2116_vm1 = vmor %vm156_vm7, %vm157_vm12 }
  0x8f   :  { %v152_v54 = vmul.f32 %v2040_v44, %v151_v50  ;;  %1678 = vrsqrt.f32 %v2067_v59  ;;  %vm137_vm14 = vweird.f32 %v2047_v48  ;;  %v149_v36 = vsel %vm2076_vm11, %v2010_v17, %v145_v62  ;;  %v2127_v17 = vld [vmem:[%s3357_s1] ss:$0 sm:$0xff]  ;;  %vm2151_vm4 = vmor %vm196_vm8, %vm197_vm13 }
  0x90   :  { %v193_v57 = vmul.f32 0.5, %v192_v51  ;;  %v132_v58 = vmul.f32 %v2047_v48, %v131_v52  ;;  %v85_v60 = vpop.xlane.xlu1 %84  ;;  %v88_v10 = vpop.xlane.xlu2 %87  ;;  %v125_v37 = vmul.f32 %v2019_v24, %v124_v56  ;;  %v189_v16 = vsel %vm2099_vm15, %v2004_v14, %v2059_v53  ;;  %vm2137_vm2 = vmor %vm136_vm9, %vm137_vm14 }
  0x91   :  { %v82_v61 = vpop.xlane.xlu0 %81  ;;  %v153_v5 = vmul.f32 0.5, %v152_v54  ;;  %v106_v6 = vmul.f32 %v1984_v55, %v85_v60  ;;  %v107_v31 = vmul.f32 %v1984_v55, %v88_v10  ;;  %vm166_vm5 = vweird.f32 %v2038_v43  ;;  %vm2165_vm7 = vmor %vm126_vm10, %vm127_vm6 }
  0x92   :  { %v105_v9 = vmul.f32 %v1984_v55, %v82_v61  ;;  %v194_v13 = vsub.f32 1.5, %v193_v57  ;;  %v133_v18 = vmul.f32 0.5, %v132_v58  ;;  %v242_v51 = vmul.f32 %v149_v36, %v1860_v1 }
  0x93   :  { %v2082_v23 = vpop.eup %1674  ;;  %v154_v25 = vsub.f32 1.5, %v153_v5  ;;  %v2084_v26 = vadd.f32 1e-06, %v106_v6  ;;  %v2143_v46 = vadd.f32 1e-06, %v107_v31  ;;  %vm176_vm8 = vweird.f32 %v2036_v42 }
  0x94   :  { %v2086_v27 = vadd.f32 1e-06, %v105_v9  ;;  %v134_v3 = vsub.f32 1.5, %v133_v18  ;;  %v171_v32 = vmul.f32 %v2082_v23, %v2036_v42  ;;  %v2093_v33 = vpop.eup %1676  ;;  %v2104_v55 = vmul.f32 %v2033_v40, %v194_v13 }
  0x95   :  { %v155_v35 = vmul.f32 %v2040_v44, %v154_v25  ;;  %1680 = vrsqrt.f32 %v2084_v26  ;;  %v161_v41 = vmul.f32 %v2093_v33, %v2038_v43  ;;  %vm177_vm3 = vweird.f32 %v2082_v23  ;;  %v2145_v47 = vpop.eup %1678 }
  0x96   :  { %v135_v38 = vmul.f32 %v2047_v48, %v134_v3  ;;  %v172_v39 = vmul.f32 %v2082_v23, %v171_v32  ;;  %1682 = vrsqrt.f32 %v2086_v27  ;;  %v201_v1 = vmul.f32 %v2145_v47, %v2067_v59  ;;  %vm2233_vm14 = vmor %vm176_vm8, %vm177_vm3 }
  0x97   :  { %v162_v50 = vmul.f32 %v2093_v33, %v161_v41  ;;  %v159_v52 = vsel %vm2116_vm1, %v2040_v44, %v155_v35  ;;  %1684 = vrsqrt.f32 %v2143_v46  ;;  %v258_v56 = vmul.f32 %v2127_v17, %v242_v51 }
  0x98   :  { %v139_v22 = vsel %vm2137_vm2, %v2047_v48, %v135_v38  ;;  %v173_v49 = vmul.f32 0.5, %v172_v39  ;;  %v199_v48 = vsel %vm2151_vm4, %v2033_v40, %v2104_v55  ;;  %v2185_v53 = vpop.permute.xlu2 %534  ;;  %v129_v44 = vsel %vm2165_vm7, %v2019_v24, %v125_v37 }
  0x99   :  { %v163_v40 = vmul.f32 0.5, %v162_v50  ;;  %vm167_vm6 = vweird.f32 %v2093_v33  ;;  %v202_v58 = vmul.f32 %v2145_v47, %v201_v1  ;;  %vm206_vm9 = vweird.f32 %v2067_v59 }
  0x9a   :  { %v174_v54 = vsub.f32 1.5, %v173_v49  ;;  %vm216_vm10 = vweird.f32 %v2086_v27  ;;  %v240_v60 = vmul.f32 %v129_v44, %v1865_v2  ;;  %v241_v61 = vmul.f32 %v139_v22, %v1889_v12  ;;  %vm2243_vm15 = vmor %vm166_vm5, %vm167_vm6 }
  0x9b   :  { %v2191_v57 = vpop.eup %1680  ;;  %v164_v62 = vsub.f32 1.5, %v163_v40  ;;  %vm207_vm11 = vweird.f32 %v2145_v47  ;;  %vm226_vm12 = vweird.f32 %v2084_v26  ;;  %v243_v5 = vmul.f32 %v159_v52, %v1881_v8 }
  0x9c   :  { %v221_v24 = vmul.f32 %v2191_v57, %v2084_v26  ;;  %v2204_v6 = vpop.eup %1682  ;;  %v203_v9 = vmul.f32 0.5, %v202_v58  ;;  %v353_v10 = vmul.f32 %v2183_v4, %v258_v56  ;;  %v256_v11 = vmul.f32 %v2127_v17, %v240_v60  ;;  %vm2254_vm2 = vmor %vm206_vm9, %vm207_vm11 }
  0x9d   :  { %v257_v2 = vmul.f32 %v2127_v17, %v241_v61  ;;  %v175_v12 = vmul.f32 %v2082_v23, %v174_v54  ;;  %vm227_vm13 = vweird.f32 %v2191_v57  ;;  %v211_v18 = vmul.f32 %v2204_v6, %v2086_v27  ;;  %v2214_v25 = vpop.eup %1684 }
  0x9e   :  { %v222_v13 = vmul.f32 %v2191_v57, %v221_v24  ;;  %v204_v8 = vsub.f32 1.5, %v203_v9  ;;  %v369_v31 = vsel %vm52_vm0, %v353_v10, 0.0  ;;  %v351_v3 = vmul.f32 %v2183_v4, %v256_v11  ;;  %vm2267_vm3 = vmor %vm226_vm12, %vm227_vm13 }
  0x9f   :  { %v268_v32 = vpack.c.bf16 %v257_v2, %v256_v11  ;;  %v165_v34 = vmul.f32 %v2093_v33, %v164_v62  ;;  %v212_v35 = vmul.f32 %v2204_v6, %v211_v18  ;;  %v231_v36 = vmul.f32 %v2214_v25, %v2143_v46  ;;  %370 = vadd.xlane.f32.xlu2 %v369_v31 }
  0xa0   :  { %v223_v55 = vmul.f32 0.5, %v222_v13  ;;  %v205_v37 = vmul.f32 %v2145_v47, %v204_v8  ;;  %v363_v63 = vsel %vm52_vm0, %v351_v3, 0.0  ;;  %v259_v38 = vmul.f32 %v2127_v17, %v243_v5  ;;  %v2227_v41 = vpop.permute.xlu2 %543 }
  0xa1   :  { %1513 = vmatmul.msk.bf16.vlgmr.msra.gmra.mxu0 %vm52_vm0, %v268_v32  ;;  %v246_v39 = vmul.f32 %v189_v16, %v1855_v0  ;;  %v213_v22 = vmul.f32 0.5, %v212_v35  ;;  %v232_v49 = vmul.f32 %v2214_v25, %v231_v36  ;;  %364 = vadd.xlane.f32.xlu0 %v363_v63  ;;  %v247_v50 = vmul.f32 %v199_v48, %v1876_v7  ;;  %v1192_v7 = vld [vmem:[%s3362_s6 + $0x10] sm:$0xff] }
  0xa2   :  { %v224_v14 = vsub.f32 1.5, %v223_v55  ;;  %vm217_vm1 = vweird.f32 %v2204_v6  ;;  %v269_v42 = vpack.c.bf16 %v259_v38, %v258_v56  ;;  %v354_v51 = vmul.f32 %v2183_v4, %v259_v38 }
  0xa3   :  { %v262_v16 = vmul.f32 %v2127_v17, %v246_v39  ;;  %v214_v15 = vsub.f32 1.5, %v213_v22  ;;  %v233_v48 = vmul.f32 0.5, %v232_v49  ;;  %v263_v52 = vmul.f32 %v2127_v17, %v247_v50  ;;  %vm2287_vm5 = vmor %vm216_vm10, %vm217_vm1 }
  0xa4   :  { %v225_v43 = vmul.f32 %v2191_v57, %v224_v14  ;;  %v209_v1 = vsel %vm2254_vm2, %v2145_v47, %v205_v37  ;;  %vm237_vm4 = vweird.f32 %v2214_v25  ;;  %1514 = vmatmul.msk.bf16.vlgmr.msra.gmra.mxu1 %vm52_vm0, %v269_v42  ;;  %v352_v54 = vmul.f32 %v2183_v4, %v257_v2  ;;  %v2277_v56 = vpop.permute.xlu0 %537  ;;  %v770_v42 = vld [vmem:[%s3361_s5] sm:$0xff] }
  0xa5   :  { %v179_v40 = vsel %vm2233_vm14, %v2082_v23, %v175_v12  ;;  %v215_v47 = vmul.f32 %v2204_v6, %v214_v15  ;;  %v234_v58 = vsub.f32 1.5, %v233_v48  ;;  %v271_v60 = vpack.c.bf16 %v263_v52, %v262_v16 }
  0xa6   :  { %v229_v26 = vsel %vm2267_vm3, %v2191_v57, %v225_v43  ;;  %v372_v23 = vsel %vm52_vm0, %v354_v51, 0.0  ;;  %v366_v61 = vsel %vm52_vm0, %v352_v54, 0.0  ;;  %v245_v62 = vmul.f32 %v179_v40, %v1903_v19  ;;  %v772_v51 = vld [vmem:[%s3361_s5 + $0x10] sm:$0xff]  ;;  %v1191_v54 = vld [vmem:[%s3362_s6 + $0x8] sm:$0xff] }
  0xa7   :  { %v169_v57 = vsel %vm2243_vm15, %v2093_v33, %v165_v34  ;;  %v235_v24 = vmul.f32 %v2214_v25, %v234_v58  ;;  %vm236_vm7 = vweird.f32 %v2143_v46  ;;  %1516 = vmatmul.msk.bf16.vlgmr.msra.gmra.mxu2 %vm52_vm0, %v271_v60  ;;  %367 = vadd.xlane.f32.xlu1 %v366_v61  ;;  %v219_v9 = vsel %vm2287_vm5, %v2204_v6, %v215_v47 }
  0xa8   :  { %v244_v27 = vmul.f32 %v169_v57, %v1908_v20  ;;  %v2301_v5 = vpop.permute.xlu1 %540  ;;  %vm238_vm8 = vmor %vm236_vm7, %vm237_vm4  ;;  %v261_v19 = vmul.f32 %v2127_v17, %v245_v62  ;;  %v248_v33 = vmul.f32 %v209_v1, %v1913_v21  ;;  %v250_v46 = vmul.f32 %v229_v26, %v1927_v28  ;;  %v2311_v10 = vpop.permute.xlu2 %546  ;;  %v771_v1 = vld [vmem:[%s3361_s5 + $0x8] sm:$0xff] }
  0xa9   :  { %v239_v11 = vsel %vm238_vm8, %v2214_v25, %v235_v24  ;;  %373 = vadd.xlane.f32.xlu0 %v372_v23  ;;  %v531_v2 = vlaneseq  ;;  %v249_v18 = vmul.f32 %v219_v9, %v1932_v29  ;;  %v357_v8 = vmul.f32 %v2183_v4, %v262_v16  ;;  %v1190_v16 = vld [vmem:[%s3362_s6] sm:$0xff] }
  0xaa   :  { %v260_v20 = vmul.f32 %v2127_v17, %v244_v27  ;;  %v356_v12 = vmul.f32 %v2183_v4, %v261_v19  ;;  %v251_v6 = vmul.f32 %v239_v11, %v1937_v30  ;;  %v266_v21 = vmul.f32 %v2127_v17, %v250_v46 }
  0xab   :  { %v264_v25 = vmul.f32 %v2127_v17, %v248_v33  ;;  %v2325_v32 = vand.u32 127, %v531_v2  ;;  %v265_v29 = vmul.f32 %v2127_v17, %v249_v18  ;;  %v381_v35 = vsel %vm52_vm0, %v357_v8, 0.0 }
  0xac   :  { %v355_v13 = vmul.f32 %v2183_v4, %v260_v20  ;;  %v378_v28 = vsel %vm52_vm0, %v356_v12, 0.0  ;;  %v267_v31 = vmul.f32 %v2127_v17, %v251_v6  ;;  %v2327_v34 = vpop.permute.xlu0 %555  ;;  %v270_v17 = vpack.c.bf16 %v261_v19, %v260_v20 }
  0xad   :  { %379 = vadd.xlane.f32.xlu2 %v378_v28  ;;  %vm576_vm6 = vcmp.eq.s32.totalorder %v2325_v32, %v2327_v34  ;;  %v359_v36 = vmul.f32 %v2183_v4, %v264_v25  ;;  %v358_v63 = vmul.f32 %v2183_v4, %v263_v52  ;;  %v272_v38 = vpack.c.bf16 %v265_v29, %v264_v25 }
  0xae   :  { %v375_v3 = vsel %vm52_vm0, %v355_v13, 0.0  ;;  %v273_v30 = vpack.c.bf16 %v267_v31, %v266_v21  ;;  %v2349_v14 = vmul.f32 %v2183_v4, %v266_v21  ;;  %v2352_v22 = vmul.f32 %v2183_v4, %v267_v31 }
  0xaf   :  { %376 = vadd.xlane.f32.xlu1 %v375_v3  ;;  %v387_v39 = vsel %vm52_vm0, %v359_v36, 0.0  ;;  %v384_v45 = vsel %vm52_vm0, %v358_v63, 0.0  ;;  %v2359_v50 = vmul.f32 %v2183_v4, %v265_v29  ;;  %vm782_vm12 = vcmp.ne.f32.partialorder %v770_v42, -100.0 }
  0xb0   :  { %v2332_v55 = vpop.permute.xlu1 %552  ;;  %1518 = vmatmul.msk.bf16.vlgmr.msra.gmra.mxu3 %vm52_vm0, %v273_v30  ;;  %v2337_v37 = vpop.permute.xlu2 %549  ;;  %vm1202_vm13 = vcmp.ne.f32.partialorder %v1190_v16, -100.0  ;;  %vm784_vm14 = vcmp.ne.f32.partialorder %v772_v51, -100.0  ;;  %vm1204_vm15 = vcmp.ne.f32.partialorder %v1192_v7, -100.0  ;;  %v3364_v43 = vmov 0.0  }
  0xb1   :  { %3441 = vst [vmem:[#allocation5_spill] sm:$0xff] %v2332_v55  ;;  %vm575_vm9 = vcmp.eq.s32.totalorder %v2325_v32, %v2332_v55  ;;  %382 = vadd.xlane.f32.xlu0 %v381_v35  ;;  %vm574_vm10 = vcmp.eq.s32.totalorder %v2325_v32, %v2337_v37  ;;  %v2378_v15 = vsel %vm782_vm12, 1.0, %v3364_v43  ;;  %v2381_v48 = vsel %vm1202_vm13, 1.0, %v3364_v43 }
  0xb2   :  { %3444 = vst [vmem:[#allocation8_spill] sm:$0xff] %v2378_v15  ;;  %v2384_v52 = vsel %vm784_vm14, 1.0, %v3364_v43  ;;  %v2390_v59 = vsel %vm1204_vm15, 1.0, %v3364_v43  ;;  %v2396_v40 = vmul.f32 %v2378_v15, %v770_v42  ;;  %v2399_v26 = vmul.f32 %v2381_v48, %v1190_v16 }
  0xb3   :  { %3445 = vst [vmem:[#allocation9_spill] sm:$0xff] %v2381_v48  ;;  %v2405_v58 = vmul.f32 %v2384_v52, %v772_v51  ;;  %vm783_vm1 = vcmp.ne.f32.partialorder %v771_v1, -100.0  ;;  %v2410_v23 = vmul.f32 %v2390_v59, %v1192_v7  ;;  %vm1203_vm2 = vcmp.ne.f32.partialorder %v1191_v54, -100.0 }
  0xb4   :  { %1515 = vmatmul.msk.bf16.gmra.mxu1 %vm52_vm0, %v270_v17  ;;  %v2361_v0 = vpop.permute.xlu0 %564  ;;  %3446 = vst [vmem:[#allocation10_spill] sm:$0xff] %v2384_v52  ;;  %vm998_vm3 = vcmp.ge.f32.partialorder %v2396_v40, 0.5  ;;  %vm1286_vm4 = vcmp.ge.f32.partialorder %v2399_v26, 0.5  ;;  %v2418_v57 = vsel %vm783_vm1, 1.0, %v3364_v43  ;;  %v2423_v27 = vsel %vm1203_vm2, 1.0, %v3364_v43 }
  0xb5   :  { %388 = vadd.xlane.f32.xlu2 %v387_v39  ;;  %3447 = vst [vmem:[#allocation11_spill] sm:$0xff] %v2390_v59  ;;  %vm1000_vm7 = vcmp.ge.f32.partialorder %v2405_v58, 0.5  ;;  %vm1288_vm12 = vcmp.ge.f32.partialorder %v2410_v23, 0.5  ;;  %v1567_v9 = vsel %vm998_vm3, 1.0, %v3364_v43  ;;  %v1603_v19 = vsel %vm1286_vm4, 1.0, %v3364_v43 }
  0xb6   :  { %3449 = vst [vmem:[#allocation13_spill] sm:$0xff] %v2418_v57  ;;  %v2430_v46 = vmul.f32 %v2418_v57, %v771_v1  ;;  %v1569_v11 = vsel %vm1000_vm7, 1.0, %v3364_v43  ;;  %v2435_v2 = vmul.f32 %v2423_v27, %v1191_v54  ;;  %v1605_v12 = vsel %vm1288_vm12, 1.0, %v3364_v43 }
  0xb7   :  { %1517 = vmatmul.msk.bf16.gmra.mxu2 %vm52_vm0, %v272_v38  ;;  %385 = vadd.xlane.f32.xlu1 %v384_v45  ;;  %3450 = vst [vmem:[#allocation14_spill] sm:$0xff] %v2423_v27 }
  0xb8   :  { %v2354_v49 = vpop.permute.xlu2 %558  ;;  %v2407_v60 = vpop.permute.xlu1 %561  ;;  %vm999_vm1 = vcmp.ge.f32.partialorder %v2430_v46, 0.5  ;;  %vm1287_vm3 = vcmp.ge.f32.partialorder %v2435_v2, 0.5 }
  0xb9   :  { %3442 = vst [vmem:[#allocation6_spill] sm:$0xff] %v2354_v49  ;;  %vm577_vm11 = vcmp.eq.s32.totalorder %v2325_v32, %v2354_v49  ;;  %v1568_v25 = vsel %vm999_vm1, 1.0, %v3364_v43  ;;  %v1604_v30 = vsel %vm1287_vm3, 1.0, %v3364_v43  ;;  %vm569_vm1 = vcmp.eq.s32.totalorder %v2325_v32, %v2185_v53 }
  0xba   :  { %3448 = vst [vmem:[#allocation12_spill] sm:$0xff] %v2407_v60 }
  0xc0   :  { %v2375_v4 = vpop.permute.xlu2 %567 }
  0xc1   :  { %3443 = vst [vmem:[#allocation7_spill] sm:$0xff] %v2375_v4 }
 0x112   :  { %v2415_v62 = vpop.xlane.xlu2 %370 }
 0x113   :  { %vm964_vm8 = vcmp.ge.f32.partialorder %v2415_v62, 0.0  ;;  %v1252_v49 = vmul.f32 %v2410_v23, %v2415_v62 }
 0x114   :  { %v2401_v47 = vpop.xlane.xlu0 %364  ;;  %v1557_v20 = vsel %vm964_vm8, 1.0, %v3364_v43 }
 0x115   :  { %v866_v44 = vand.u32 2147483647, %v2401_v47  ;;  %vm962_vm5 = vcmp.ge.f32.partialorder %v2401_v47, 0.0  ;;  %vm1036_vm15 = vcmp.eq.f32.partialorder %v1557_v20, %v1569_v11  ;;  %vm1324_vm2 = vcmp.eq.f32.partialorder %v1557_v20, %v1605_v12 }
 0x116   :  { %v1555_v33 = vsel %vm962_vm5, 1.0, %v3364_v43  ;;  %v1581_v8 = vsel %vm1036_vm15, 1.0, %v3364_v43  ;;  %v1617_v3 = vsel %vm1324_vm2, 1.0, %v3364_v43  ;;  %vm701_vm5 = vcmask 7168  }
 0x117   :  { %v878_v61 = vsub.f32 0.0, %v866_v44  ;;  %vm1034_vm13 = vcmp.eq.f32.partialorder %v1555_v33, %v1567_v9  ;;  %vm1322_vm14 = vcmp.eq.f32.partialorder %v1555_v33, %v1603_v19  ;;  %v1072_v63 = vmul.f32 %v1581_v8, %v2384_v52 }
 0x118   :  { %v1579_v18 = vsel %vm1034_vm13, 1.0, %v3364_v43  ;;  %v1615_v21 = vsel %vm1322_vm14, 1.0, %v3364_v43  ;;  %v1360_v45 = vmul.f32 %v1617_v3, %v2390_v59 }
 0x119   :  { %v890_v24 = vmul.f32 1.442695, %v878_v61  ;;  %v1070_v35 = vmul.f32 %v1579_v18, %v2378_v15  ;;  %v1358_v36 = vmul.f32 %v1615_v21, %v2381_v48  ;;  %v868_v61 = vand.u32 2147483647, %v2415_v62 }
 0x11a   :  { %v2443_v13 = vpop.xlane.xlu1 %367  ;;  %v1161_v9 = vsel %vm701_vm5, %v1072_v63, 0.0  ;;  %v1449_v11 = vsel %vm701_vm5, %v1360_v45, 0.0 }
 0x11b   :  { %1686 = vpow2.f32 %v890_v24  ;;  %v867_v29 = vand.u32 2147483647, %v2443_v13  ;;  %vm963_vm4 = vcmp.ge.f32.partialorder %v2443_v13, 0.0  ;;  %v1158_v54 = vsel %vm701_vm5, %v1070_v35, 0.0 }
 0x11c   :  { %v1556_v17 = vsel %vm963_vm4, 1.0, %v3364_v43  ;;  %v2461_v42 = vpop.xlane.xlu0 %373  ;;  %v1446_v44 = vsel %vm701_vm5, %v1358_v36, 0.0  ;;  %v880_v8 = vsub.f32 0.0, %v868_v61  ;;  %v830_v36 = vmax.f32 %v2401_v47, 0.0 }
 0x11d   :  { %v879_v38 = vsub.f32 0.0, %v867_v29  ;;  %vm1035_vm7 = vcmp.eq.f32.partialorder %v1556_v17, %v1568_v25  ;;  %vm1323_vm8 = vcmp.eq.f32.partialorder %v1556_v17, %v1604_v30  ;;  %v869_v19 = vand.u32 2147483647, %v2461_v42  ;;  %v773_v25 = vld [vmem:[%s3361_s5 + $0x18] sm:$0xff] }
 0x11e   :  { %v2438_v6 = vpop.f32.mrf.mxu0  ;;  %v1580_v16 = vsel %vm1035_vm7, 1.0, %v3364_v43  ;;  %v1616_v1 = vsel %vm1323_vm8, 1.0, %v3364_v43  ;;  %vm785_vm12 = vcmp.ne.f32.partialorder %v773_v25, -100.0  ;;  %v894_v45 = vmul.f32 1.442695, %v880_v8 }
 0x11f   :  { %411 = vmax.xlane.f32.xlu0 %v2438_v6  ;;  %v892_v51 = vmul.f32 1.442695, %v879_v38  ;;  %v1071_v7 = vmul.f32 %v1580_v16, %v2418_v57  ;;  %v1359_v24 = vmul.f32 %v1616_v1, %v2423_v27  ;;  %v881_v30 = vsub.f32 0.0, %v869_v19 }
 0x120   :  { %v842_v38 = vmul.f32 %v2396_v40, %v2401_v47  ;;  %vm965_vm8 = vcmp.ge.f32.partialorder %v2461_v42, 0.0 }
 0x121   :  { %v2447_v28 = vpop.f32.mrf.mxu1  ;;  %v1687_v31 = vpop.eup %1686  ;;  %1688 = vpow2.f32 %v892_v51  ;;  %v1159_v33 = vsel %vm701_vm5, %v1071_v7, 0.0  ;;  %v1447_v12 = vsel %vm701_vm5, %v1359_v24, 0.0  ;;  %v774_v51 = vld [vmem:[%s3361_s5 + $0x20] sm:$0xff] }
 0x122   :  { %415 = vmax.xlane.f32.xlu2 %v2447_v28  ;;  %v914_v39 = vadd.f32 1.0, %v1687_v31  ;;  %v1160_v20 = vadd.f32 %v1159_v33, %v1158_v54  ;;  %v1448_v21 = vadd.f32 %v1447_v12, %v1446_v44  ;;  %v1193_v31 = vld [vmem:[%s3362_s6 + $0x18] sm:$0xff]  ;;  %v2489_v17 = vpop.xlane.xlu1 %376  ;;  %v1194_v7 = vld [vmem:[%s3362_s6 + $0x20] sm:$0xff]  ;;  %v896_v54 = vmul.f32 1.442695, %v881_v30 }
 0x123   :  { %vm1205_vm13 = vcmp.ne.f32.partialorder %v1193_v31, -100.0  ;;  %v2504_v44 = vsel %vm785_vm12, 1.0, %v3364_v43  ;;  %v870_v40 = vand.u32 2147483647, %v2489_v17  ;;  %vm786_vm14 = vcmp.ne.f32.partialorder %v774_v51, -100.0 }
 0x124   :  { %1690 = vlog2.f32 %v914_v39  ;;  %v2484_v3 = vadd.f32 %v1161_v9, %v1160_v20  ;;  %v2486_v29 = vadd.f32 %v1449_v11, %v1448_v21  ;;  %v1250_v39 = vmul.f32 %v2399_v26, %v2401_v47  ;;  %3451 = vst [vmem:[#allocation15_spill] sm:$0xff] %v2504_v44 }
 0x125   :  { %v2508_v47 = vsel %vm1205_vm13, 1.0, %v3364_v43  ;;  %vm1206_vm15 = vcmp.ne.f32.partialorder %v1194_v7, -100.0  ;;  %v854_v61 = vsub.f32 %v830_v36, %v842_v38  ;;  %v882_v9 = vsub.f32 0.0, %v870_v40 }
 0x126   :  { %3452 = vst [vmem:[#allocation16_spill] sm:$0xff] %v2508_v47  ;;  %v1262_v24 = vsub.f32 %v830_v36, %v1250_v39  ;;  %v831_v33 = vmax.f32 %v2443_v13, 0.0  ;;  %v843_v11 = vmul.f32 %v2430_v46, %v2443_v13  ;;  %v1251_v20 = vmul.f32 %v2435_v2, %v2443_v13  ;;  %v2524_v36 = vpop.xlane.xlu2 %379 }
 0x127   :  { %v1689_v35 = vpop.eup %1688  ;;  %v2519_v12 = vmul.f32 %v2504_v44, %v773_v25  ;;  %v898_v21 = vmul.f32 1.442695, %v882_v9  ;;  %v2527_v38 = vmul.f32 %v2508_v47, %v1193_v31  ;;  %v2531_v46 = vsel %vm786_vm14, 1.0, %v3364_v43  ;;  %v1195_v31 = vld [vmem:[%s3362_s6 + $0x28] sm:$0xff] }
 0x128   :  { %v915_v16 = vadd.f32 1.0, %v1689_v35  ;;  %v775_v35 = vld [vmem:[%s3361_s5 + $0x28] sm:$0xff]  ;;  %3453 = vst [vmem:[#allocation17_spill] sm:$0xff] %v2531_v46  ;;  %v2535_v2 = vsel %vm1206_vm15, 1.0, %v3364_v43  ;;  %v855_v13 = vsub.f32 %v831_v33, %v843_v11  ;;  %v1263_v39 = vsub.f32 %v831_v33, %v1251_v20 }
 0x129   :  { %v2501_v1 = vpop.f32.mrf.mxu1  ;;  %3454 = vst [vmem:[#allocation18_spill] sm:$0xff] %v2535_v2  ;;  %vm1001_vm2 = vcmp.ge.f32.partialorder %v2519_v12, 0.5  ;;  %vm787_vm3 = vcmp.ne.f32.partialorder %v775_v35, -100.0  ;;  %vm1289_vm4 = vcmp.ge.f32.partialorder %v2527_v38, 0.5  ;;  %v2550_v33 = vmul.f32 %v2531_v46, %v774_v51 }
 0x12a   :  { %v2475_v18 = vpop.f32.mrf.mxu2  ;;  %v1691_v63 = vpop.eup %1690  ;;  %1692 = vlog2.f32 %v915_v16  ;;  %v871_v16 = vand.u32 2147483647, %v2524_v36  ;;  %v2553_v11 = vmul.f32 %v2535_v2, %v1194_v7  ;;  %vm1207_vm7 = vcmp.ne.f32.partialorder %v1195_v31, -100.0 }
 0x12b   :  { %423 = vmax.xlane.f32.xlu0 %v2475_v18  ;;  %v927_v26 = vmul.f32 0.6931472, %v1691_v63  ;;  %1694 = vpow2.f32 %v894_v45  ;;  %vm1002_vm12 = vcmp.ge.f32.partialorder %v2550_v33, 0.5  ;;  %vm966_vm13 = vcmp.ge.f32.partialorder %v2489_v17, 0.0 }
 0x12c   :  { %1696 = vpow2.f32 %v896_v54  ;;  %v883_v20 = vsub.f32 0.0, %v871_v16  ;;  %vm570_vm14 = vcmp.eq.s32.totalorder %v2325_v32, %v2277_v56  ;;  %vm1290_vm15 = vcmp.ge.f32.partialorder %v2553_v11, 0.5 }
 0x12d   :  { %v950_v8 = vadd.f32 %v927_v26, %v854_v61  ;;  %v1274_v30 = vadd.f32 %v1262_v24, %v927_v26  ;;  %1698 = vpow2.f32 %v898_v21  ;;  %v1253_v23 = vmul.f32 %v2527_v38, %v2461_v42 }
 0x12f   :  { %v1082_v26 = vmul.f32 %v2378_v15, %v950_v8  ;;  %v1370_v61 = vmul.f32 %v2381_v48, %v1274_v30  ;;  %v3457_v30 = vmov 0.0  }
 0x130   :  { %v1693_v63 = vpop.eup %1692  ;;  %v1570_v48 = vsel %vm1001_vm2, 1.0, %v3457_v30  ;;  %v1571_v53 = vsel %vm1002_vm12, 1.0, %v3457_v30  ;;  %v1607_v15 = vsel %vm1290_vm15, 1.0, %v3457_v30  ;;  %vm571_vm12 = vcmp.eq.s32.totalorder %v2325_v32, %v2301_v5 }
 0x131   :  { %v929_v25 = vmul.f32 0.6931472, %v1693_v63  ;;  %v1695_v45 = vpop.eup %1694  ;;  %v2544_v54 = vpop.f32.mrf.mxu1  ;;  %v1094_v16 = vsel %vm701_vm5, %v1082_v26, 0.0  ;;  %v1558_v26 = vsel %vm965_vm8, 1.0, %v3457_v30  ;;  %v2901_v37 = vsel %vm576_vm6, 1.0, %v3457_v30 }
 0x132   :  { %v2511_v19 = vpop.f32.mrf.mxu2  ;;  %v1697_v40 = vpop.eup %1696  ;;  %v916_v51 = vadd.f32 1.0, %v1695_v45  ;;  %vm1037_vm2 = vcmp.eq.f32.partialorder %v1558_v26, %v1570_v48  ;;  %v845_v48 = vmul.f32 %v2519_v12, %v2461_v42 }
 0x133   :  { %417 = vmax.xlane.f32.xlu0 %v2501_v1  ;;  %v951_v24 = vadd.f32 %v929_v25, %v855_v13  ;;  %v1275_v9 = vadd.f32 %v1263_v39, %v929_v25  ;;  %v2557_v63 = vpop.f32.mrf.mxu3  ;;  %v2563_v13 = vsel %vm787_vm3, 1.0, %v3457_v30  ;;  %v917_v7 = vadd.f32 1.0, %v1697_v40  ;;  %v1699_v39 = vpop.eup %1698 }
 0x134   :  { %3456 = vst [vmem:[#allocation20_spill] sm:$0xff] %v2557_v63  ;;  %431 = vmax.xlane.f32.xlu1 %v2557_v63  ;;  %v900_v25 = vmul.f32 1.442695, %v883_v20  ;;  %v1606_v40 = vsel %vm1289_vm4, 1.0, %v3457_v30  ;;  %v2596_v20 = vsel %vm569_vm1, 1.0, %v3457_v30  ;;  %vm967_vm4 = vcmp.ge.f32.partialorder %v2524_v36, 0.0 }
 0x135   :  { %v1083_v43 = vmul.f32 %v2418_v57, %v951_v24  ;;  %v1371_v8 = vmul.f32 %v2423_v27, %v1275_v9  ;;  %3458 = vst [vmem:[#allocation21_spill] sm:$0xff] %v2563_v13  ;;  %v1382_v24 = vsel %vm701_vm5, %v1370_v61, 0.0  ;;  %v2586_v61 = vmul.f32 %v2563_v13, %v775_v35 }
 0x136   :  { %1700 = vpow2.f32 %v900_v25  ;;  %v844_v35 = vmul.f32 %v2405_v58, %v2415_v62  ;;  %vm1325_vm3 = vcmp.eq.f32.partialorder %v1558_v26, %v1606_v40  ;;  %v1560_v26 = vsel %vm967_vm4, 1.0, %v3457_v30 }
 0x137   :  { %v1095_v9 = vsel %vm701_vm5, %v1083_v43, 0.0  ;;  %v1383_v27 = vsel %vm701_vm5, %v1371_v8, 0.0  ;;  %v918_v43 = vadd.f32 1.0, %v1699_v39  ;;  %1702 = vlog2.f32 %v916_v51 }
 0x138   :  { %v2575_v57 = vadd.f32 %v1095_v9, %v1094_v16  ;;  %v2577_v45 = vadd.f32 %v1383_v27, %v1382_v24  ;;  %v2590_v27 = vsel %vm1207_vm7, 1.0, %v3457_v30  ;;  %1704 = vlog2.f32 %v917_v7  ;;  %v2615_v16 = vpop.f32.mrf.mxu0 }
 0x139   :  { %3459 = vst [vmem:[#allocation22_spill] sm:$0xff] %v2590_v27  ;;  %v832_v8 = vmax.f32 %v2415_v62, 0.0  ;;  %v2604_v51 = vpop.f32.mrf.mxu1  ;;  %1706 = vlog2.f32 %v918_v43  ;;  %v1559_v7 = vsel %vm966_vm13, 1.0, %v3457_v30  ;;  %v2613_v39 = vmul.f32 %v2590_v27, %v1195_v31 }
 0x13a   :  { %v2555_v21 = vpop.f32.mrf.mxu2  ;;  %vm1003_vm1 = vcmp.ge.f32.partialorder %v2586_v61, 0.5  ;;  %v393_v24 = vsel %vm52_vm0, %v2349_v14, 0.0  ;;  %v396_v31 = vsel %vm52_vm0, %v2352_v22, 0.0  ;;  %v1582_v9 = vsel %vm1037_vm2, 1.0, %v3457_v30 }
 0x13b   :  { %3455 = vst [vmem:[#allocation19_spill] sm:$0xff] %v2555_v21  ;;  %427 = vmax.xlane.f32.xlu2 %v2555_v21  ;;  %v1618_v43 = vsel %vm1325_vm3, 1.0, %v3457_v30  ;;  %v856_v63 = vsub.f32 %v832_v8, %v844_v35  ;;  %v833_v14 = vmax.f32 %v2461_v42, 0.0  ;;  %vm1038_vm7 = vcmp.eq.f32.partialorder %v1559_v7, %v1571_v53 }
 0x13c   :  { %v1701_v58 = vpop.eup %1700  ;;  %413 = vmax.xlane.f32.xlu1 %v2615_v16  ;;  %v1572_v40 = vsel %vm1003_vm1, 1.0, %v3457_v30  ;;  %vm1291_vm8 = vcmp.ge.f32.partialorder %v2613_v39, 0.5  ;;  %v1073_v35 = vmul.f32 %v1582_v9, %v2504_v44  ;;  %v1361_v62 = vmul.f32 %v1618_v43, %v2508_v47 }
 0x13d   :  { %v919_v60 = vadd.f32 1.0, %v1701_v58  ;;  %v1703_v4 = vpop.eup %1702  ;;  %v834_v58 = vmax.f32 %v2489_v17, 0.0  ;;  %v1583_v55 = vsel %vm1038_vm7, 1.0, %v3457_v30  ;;  %vm1326_vm13 = vcmp.eq.f32.partialorder %v1559_v7, %v1607_v15 }
 0x13e   :  { %v1705_v22 = vpop.eup %1704  ;;  %v931_v12 = vmul.f32 0.6931472, %v1703_v4  ;;  %v846_v9 = vmul.f32 %v2550_v33, %v2489_v17  ;;  %vm1039_vm15 = vcmp.eq.f32.partialorder %v1560_v26, %v1572_v40  ;;  %vm573_vm2 = vcmp.eq.s32.totalorder %v2325_v32, %v2311_v10 }
 0x13f   :  { %1708 = vlog2.f32 %v919_v60  ;;  %v1707_v53 = vpop.eup %1706  ;;  %v933_v21 = vmul.f32 0.6931472, %v1705_v22  ;;  %v1520_v4 = vsel %vm570_vm14, 1.0, %v3457_v30  ;;  %v1264_v60 = vsub.f32 %v832_v8, %v1252_v49 }
 0x140   :  { %v857_v42 = vsub.f32 %v833_v14, %v845_v48  ;;  %v1254_v15 = vmul.f32 %v2553_v11, %v2489_v17  ;;  %v1265_v38 = vsub.f32 %v833_v14, %v1253_v23  ;;  %v935_v33 = vmul.f32 0.6931472, %v1707_v53 }
 0x141   :  { %v1074_v7 = vmul.f32 %v1583_v55, %v2531_v46  ;;  %v1619_v43 = vsel %vm1326_vm13, 1.0, %v3457_v30  ;;  %v1163_v22 = vsel %vm701_vm5, %v1073_v35, 0.0  ;;  %v1451_v56 = vsel %vm701_vm5, %v1361_v62, 0.0 }
 0x142   :  { %v2606_v25 = vpop.f32.mrf.mxu2  ;;  %v1584_v49 = vsel %vm1039_vm15, 1.0, %v3457_v30  ;;  %v952_v48 = vadd.f32 %v931_v12, %v856_v63  ;;  %v1276_v17 = vadd.f32 %v1264_v60, %v931_v12  ;;  %v953_v11 = vadd.f32 %v933_v21, %v857_v42 }
 0x143   :  { %3460 = vst [vmem:[#allocation23_spill] sm:$0xff] %v2606_v25  ;;  %421 = vmax.xlane.f32.xlu2 %v2604_v51  ;;  %429 = vmax.xlane.f32.xlu0 %v2606_v25  ;;  %v1608_v25 = vsel %vm1291_vm8, 1.0, %v3457_v30  ;;  %v1362_v14 = vmul.f32 %v1619_v43, %v2535_v2  ;;  %v835_v55 = vmax.f32 %v2524_v36, 0.0  ;;  %v847_v40 = vmul.f32 %v2586_v61, %v2524_v36 }
 0x144   :  { %425 = vmax.xlane.f32.xlu1 %v2511_v19  ;;  %vm1327_vm14 = vcmp.eq.f32.partialorder %v1560_v26, %v1608_v25  ;;  %v1165_v35 = vsel %vm701_vm5, %v1074_v7, 0.0  ;;  %v1075_v62 = vmul.f32 %v1584_v49, %v2563_v13  ;;  %v606_v63 = vmul.f32 %v1520_v4, %v2615_v16  ;;  %v2685_v7 = vpop.f32.mrf.mxu3 }
 0x145   :  { %v1709_v8 = vpop.eup %1708  ;;  %v1620_v25 = vsel %vm1327_vm14, 1.0, %v3457_v30  ;;  %v605_v53 = vmul.f32 %v2596_v20, %v2438_v6  ;;  %v1164_v12 = vadd.f32 %v1163_v22, %v2484_v3  ;;  %v1277_v61 = vadd.f32 %v1265_v38, %v933_v21 }
 0x146   :  { %v937_v26 = vmul.f32 0.6931472, %v1709_v8  ;;  %v1255_v60 = vmul.f32 %v2613_v39, %v2524_v36  ;;  %v1521_v3 = vsel %vm571_vm12, 1.0, %v3457_v30  ;;  %v1453_v20 = vsel %vm701_vm5, %v1362_v14, 0.0 }
 0x147   :  { %v1166_v4 = vadd.f32 %v1165_v35, %v1164_v12  ;;  %v1363_v43 = vmul.f32 %v1620_v25, %v2590_v27  ;;  %v1167_v36 = vsel %vm701_vm5, %v1075_v62, 0.0  ;;  %v1523_v5 = vsel %vm573_vm2, 1.0, %v3457_v30 }
 0x148   :  { %v1372_v49 = vmul.f32 %v2390_v59, %v1276_v17  ;;  %v1267_v8 = vsub.f32 %v835_v55, %v1255_v60  ;;  %vm572_vm3 = vcmp.eq.s32.totalorder %v2325_v32, %v2227_v41  ;;  %v1783_v41 = vld [vmem:[%s3360_s4 + $0x8] sm:$0xff] }
 0x149   :  { %v2696_v38 = vadd.f32 %v1167_v36, %v1166_v4  ;;  %v1782_v36 = vld [vmem:[%s3360_s4] sm:$0xff]  ;;  %vm642_vm1 = vcmp.ne.s32.totalorder %v1783_v41, 4294967196 }
 0x14a   :  { %v1279_v14 = vadd.f32 %v1267_v8, %v937_v26  ;;  %v1385_v35 = vsel %vm701_vm5, %v1372_v49, 0.0  ;;  %v1784_v49 = vld [vmem:[%s3360_s4 + $0x10] sm:$0xff] }
 0x14b   :  { %394 = vadd.xlane.f32.xlu0 %v393_v24  ;;  %397 = vadd.xlane.f32.xlu2 %v396_v31  ;;  %v858_v24 = vsub.f32 %v834_v58, %v846_v9  ;;  %v1266_v31 = vsub.f32 %v834_v58, %v1254_v15  ;;  %v1084_v58 = vmul.f32 %v2384_v52, %v952_v48  ;;  %vm643_vm4 = vcmp.ne.s32.totalorder %v1784_v49, 4294967196 }
 0x14c   :  { %v1085_v9 = vmul.f32 %v2504_v44, %v953_v11  ;;  %v859_v15 = vsub.f32 %v835_v55, %v847_v40  ;;  %433 = vmax.xlane.f32.xlu1 %v2685_v7  ;;  %v1373_v11 = vmul.f32 %v2508_v47, %v1277_v61  ;;  %v1386_v25 = vadd.f32 %v1385_v35, %v2577_v45 }
 0x14d   :  { %v954_v23 = vadd.f32 %v935_v33, %v858_v24  ;;  %v1278_v42 = vadd.f32 %v1266_v31, %v935_v33  ;;  %v1452_v33 = vadd.f32 %v1451_v56, %v2486_v29  ;;  %v1097_v22 = vsel %vm701_vm5, %v1084_v58, 0.0 }
 0x14e   :  { %v955_v39 = vadd.f32 %v937_v26, %v859_v15  ;;  %v1099_v48 = vsel %vm701_vm5, %v1085_v9, 0.0  ;;  %v607_v29 = vmul.f32 %v1521_v3, %v2447_v28  ;;  %v1455_v56 = vsel %vm701_vm5, %v1363_v43, 0.0  ;;  %v2734_v3 = vpop.xlane.xlu0 %382 }
 0x14f   :  { %v1086_v21 = vmul.f32 %v2531_v46, %v954_v23  ;;  %v1374_v24 = vmul.f32 %v2535_v2, %v1278_v42  ;;  %v1454_v31 = vadd.f32 %v1453_v20, %v1452_v33  ;;  %v1098_v10 = vadd.f32 %v1097_v22, %v2575_v57  ;;  %v2736_v20 = vpop.xlane.xlu2 %388 }
 0x150   :  { %v1087_v40 = vmul.f32 %v2563_v13, %v955_v39  ;;  %v609_v23 = vmul.f32 %v1523_v5, %v2544_v54  ;;  %v1387_v26 = vsel %vm701_vm5, %v1373_v11, 0.0  ;;  %v390_v45 = vsel %vm52_vm0, %v2359_v50, 0.0 }
 0x151   :  { %v2713_v17 = vadd.f32 %v1455_v56, %v1454_v31  ;;  %v1101_v55 = vsel %vm701_vm5, %v1086_v21, 0.0  ;;  %v1100_v62 = vadd.f32 %v1099_v48, %v1098_v10  ;;  %v1388_v58 = vadd.f32 %v1387_v26, %v1386_v25  ;;  %v1786_v10 = vld [vmem:[%s3360_s4 + $0x20] sm:$0xff] }
 0x152   :  { %v1103_v12 = vsel %vm701_vm5, %v1087_v40, 0.0  ;;  %v1522_v15 = vsel %vm572_vm3, 1.0, %v3457_v30  ;;  %vm641_vm0 = vcmp.ne.s32.totalorder %v1782_v36, 4294967196  ;;  %v2754_v5 = vsel %vm642_vm1, 1.0, %v3457_v30 }
 0x153   :  { %619 = vadd.xlane.f32.xlu0 %v606_v63  ;;  %617 = vadd.xlane.f32.xlu2 %v605_v53  ;;  %v1375_v63 = vmul.f32 %v2590_v27, %v1279_v14  ;;  %v1102_v57 = vadd.f32 %v1101_v55, %v1100_v62  ;;  %v1389_v53 = vsel %vm701_vm5, %v1374_v24, 0.0  ;;  %v608_v4 = vmul.f32 %v1522_v15, %v2501_v1  ;;  %v1788_v15 = vld [vmem:[%s3360_s4 + $0x30] sm:$0xff] }
 0x154   :  { %419 = vmax.xlane.f32.xlu1 %v2544_v54  ;;  %v1390_v61 = vadd.f32 %v1389_v53, %v1388_v58  ;;  %v2751_v33 = vsel %vm641_vm0, 1.0, %v3457_v30  ;;  %3465 = vst [vmem:[#allocation28_spill] sm:$0xff] %v2754_v5  ;;  %v737_v48 = vsel %vm701_vm5, %v2754_v5, 0.0  ;;  %v2766_v11 = vsel %vm643_vm4, 1.0, %v3457_v30  ;;  %v776_v58 = vld [vmem:[%s3361_s5 + $0x30] sm:$0xff] }
 0x155   :  { %v2723_v9 = vadd.f32 %v1103_v12, %v1102_v57  ;;  %v1391_v60 = vsel %vm701_vm5, %v1375_v63, 0.0  ;;  %3464 = vst [vmem:[#allocation27_spill] sm:$0xff] %v2751_v33  ;;  %v739_v14 = vsel %vm701_vm5, %v2766_v11, 0.0  ;;  %vm645_vm8 = vcmp.ne.s32.totalorder %v1786_v10, 4294967196  ;;  %v1787_v63 = vld [vmem:[%s3360_s4 + $0x28] sm:$0xff]  ;;  %v778_v10 = vld [vmem:[%s3361_s5 + $0x40] sm:$0xff] }
 0x156   :  { %v2726_v42 = vadd.f32 %v1391_v60, %v1390_v61  ;;  %3466 = vst [vmem:[#allocation29_spill] sm:$0xff] %v2766_v11  ;;  %v872_v35 = vand.u32 2147483647, %v2734_v3  ;;  %v2787_v26 = vsel %vm645_vm8, 1.0, %v3457_v30  ;;  %vm646_vm12 = vcmp.ne.s32.totalorder %v1787_v63, 4294967196  ;;  %v1196_v60 = vld [vmem:[%s3362_s6 + $0x30] sm:$0xff] }
 0x157   :  { %3469 = vst [vmem:[#allocation32_spill] sm:$0xff] %v2787_v26  ;;  %v743_v12 = vsel %vm701_vm5, %v2787_v26, 0.0  ;;  %v2798_v61 = vsel %vm646_vm12, 1.0, %v3457_v30  ;;  %vm647_vm13 = vcmp.ne.s32.totalorder %v1788_v15, 4294967196  ;;  %vm788_vm15 = vcmp.ne.f32.partialorder %v776_v58, -100.0 }
 0x158   :  { %3461 = vst [vmem:[#allocation24_spill] sm:$0xff] %v2726_v42  ;;  %v884_v53 = vsub.f32 0.0, %v872_v35  ;;  %vm1208_vm2 = vcmp.ne.f32.partialorder %v1196_v60, -100.0  ;;  %vm968_vm12 = vcmp.ge.f32.partialorder %v2734_v3, 0.0  ;;  %v874_v34 = vand.u32 2147483647, %v2736_v20 }
 0x159   :  { %3470 = vst [vmem:[#allocation33_spill] sm:$0xff] %v2798_v61 }
 0x15a   :  { %v902_v41 = vmul.f32 1.442695, %v884_v53  ;;  %v886_v26 = vsub.f32 0.0, %v874_v34 }
 0x15b   :  { %621 = vadd.xlane.f32.xlu2 %v607_v29  ;;  %625 = vadd.xlane.f32.xlu0 %v609_v23 }
 0x15c   :  { %391 = vadd.xlane.f32.xlu1 %v390_v45 }
 0x164   :  { %623 = vadd.xlane.f32.xlu1 %v608_v4 }
 0x192   :  { %v2738_v43 = vpop.xlane.xlu0 %411 }
 0x193   :  { %3462 = vst [vmem:[#allocation25_spill] sm:$0xff] %v2738_v43  ;;  %v435_v50 = vsub.f32 %v2438_v6, %v2738_v43  ;;  %v736_v6 = vsel %vm701_vm5, %v2751_v33, 0.0 }
 0x194   :  { %v738_v24 = vadd.f32 %v737_v48, %v736_v6  ;;  %v1789_v6 = vld [vmem:[%s3360_s4 + $0x38] sm:$0xff]  ;;  %v1790_v48 = vld [vmem:[%s3360_s4 + $0x40] sm:$0xff] }
 0x195   :  { %v447_v21 = vmul.f32 1.442695, %v435_v50  ;;  %v2748_v39 = vpop.xlane.xlu2 %415  ;;  %v2810_v50 = vpop.xlane.xlu1 %385  ;;  %vm648_vm14 = vcmp.ne.s32.totalorder %v1789_v6, 4294967196  ;;  %vm649_vm3 = vcmp.ne.s32.totalorder %v1790_v48, 4294967196 }
 0x196   :  { %3463 = vst [vmem:[#allocation26_spill] sm:$0xff] %v2748_v39  ;;  %v437_v22 = vsub.f32 %v2447_v28, %v2748_v39  ;;  %v1785_v28 = vld [vmem:[%s3360_s4 + $0x18] sm:$0xff]  ;;  %v740_v55 = vadd.f32 %v739_v14, %v738_v24  ;;  %v2827_v24 = vsel %vm1208_vm2, 1.0, %v3457_v30  ;;  %v2845_v35 = vsel %vm649_vm3, 1.0, %v3457_v30 }
 0x197   :  { %1710 = vpow2.f32 %v447_v21  ;;  %vm644_vm7 = vcmp.ne.s32.totalorder %v1785_v28, 4294967196  ;;  %3474 = vst [vmem:[#allocation37_spill] sm:$0xff] %v2845_v35  ;;  %vm969_vm3 = vcmp.ge.f32.partialorder %v2810_v50, 0.0 }
 0x198   :  { %v451_v8 = vmul.f32 1.442695, %v437_v22  ;;  %v2774_v29 = vsel %vm644_vm7, 1.0, %v3457_v30  ;;  %v745_v22 = vsel %vm701_vm5, %v2798_v61, 0.0  ;;  %vm790_vm7 = vcmp.ne.f32.partialorder %v778_v10, -100.0 }
 0x199   :  { %3467 = vst [vmem:[#allocation30_spill] sm:$0xff] %v2774_v29  ;;  %v741_v62 = vsel %vm701_vm5, %v2774_v29, 0.0 }
 0x19a   :  { %1712 = vpow2.f32 %v451_v8  ;;  %v742_v57 = vadd.f32 %v741_v62, %v740_v55  ;;  %v2815_v8 = vsel %vm647_vm13, 1.0, %v3457_v30  ;;  %v2848_v62 = vmul.f32 %v2827_v24, %v1196_v60  ;;  %v1197_v60 = vld [vmem:[%s3362_s6 + $0x38] sm:$0xff] }
 0x19b   :  { %3472 = vst [vmem:[#allocation35_spill] sm:$0xff] %v2815_v8  ;;  %v747_v14 = vsel %vm701_vm5, %v2815_v8, 0.0 }
 0x19c   :  { %v744_v36 = vadd.f32 %v743_v12, %v742_v57  ;;  %v1792_v57 = vld [vmem:[%s3360_s4 + $0x50] sm:$0xff]  ;;  %vm1292_vm13 = vcmp.ge.f32.partialorder %v2848_v62, 0.5 }
 0x19d   :  { %v1711_v31 = vpop.eup %1710  ;;  %vm651_vm4 = vcmp.ne.s32.totalorder %v1792_v57, 4294967196  ;;  %v1561_v57 = vsel %vm968_vm12, 1.0, %v3457_v30 }
 0x19e   :  { %v2776_v56 = vpop.xlane.xlu0 %423  ;;  %471 = vadd.xlane.f32.xlu1 %v1711_v31  ;;  %v746_v28 = vadd.f32 %v745_v22, %v744_v36  ;;  %v777_v31 = vld [vmem:[%s3361_s5 + $0x38] sm:$0xff]  ;;  %v2866_v36 = vsel %vm701_vm5, %v2845_v35, 0.0 }
 0x19f   :  { %3468 = vst [vmem:[#allocation31_spill] sm:$0xff] %v2776_v56  ;;  %v441_v40 = vsub.f32 %v2475_v18, %v2776_v56  ;;  %vm789_vm1 = vcmp.ne.f32.partialorder %v777_v31, -100.0 }
 0x1a0   :  { %v1713_v23 = vpop.eup %1712  ;;  %v748_v63 = vadd.f32 %v747_v14, %v746_v28  ;;  %v1524_v28 = vsel %vm574_vm10, 1.0, %v3457_v30  ;;  %vm579_vm10 = vcmp.eq.s32.totalorder %v2325_v32, %v2361_v0 }
 0x1a1   :  { %v459_v25 = vmul.f32 1.442695, %v441_v40  ;;  %475 = vadd.xlane.f32.xlu2 %v1713_v23  ;;  %v2838_v40 = vsel %vm648_vm14, 1.0, %v3457_v30  ;;  %v1791_v23 = vld [vmem:[%s3360_s4 + $0x48] sm:$0xff] }
 0x1a2   :  { %3473 = vst [vmem:[#allocation36_spill] sm:$0xff] %v2838_v40  ;;  %vm650_vm0 = vcmp.ne.s32.totalorder %v1791_v23, 4294967196 }
 0x1a3   :  { %1714 = vpow2.f32 %v459_v25  ;;  %v873_v25 = vand.u32 2147483647, %v2810_v50  ;;  %v2859_v15 = vsel %vm650_vm0, 1.0, %v3457_v30 }
 0x1a4   :  { %3476 = vst [vmem:[#allocation39_spill] sm:$0xff] %v2859_v15  ;;  %v2883_v48 = vsel %vm701_vm5, %v2859_v15, 0.0 }
 0x1a5   :  { %v885_v22 = vsub.f32 0.0, %v873_v25 }
 0x1a6   :  { %v2803_v45 = vpop.xlane.xlu0 %417 }
 0x1a7   :  { %3471 = vst [vmem:[#allocation34_spill] sm:$0xff] %v2803_v45  ;;  %v438_v4 = vsub.f32 %v2501_v1, %v2803_v45  ;;  %v2821_v1 = vsel %vm788_vm15, 1.0, %v3457_v30  ;;  %v2854_v53 = vpop.xlane.xlu1 %431  ;;  %vm1209_vm15 = vcmp.ne.f32.partialorder %v1197_v60, -100.0  ;;  %v904_v27 = vmul.f32 1.442695, %v885_v22 }
 0x1a8   :  { %v824_v55 = vmul.f32 %v2821_v1, %v776_v58  ;;  %3475 = vst [vmem:[#allocation38_spill] sm:$0xff] %v2854_v53  ;;  %v749_v58 = vsel %vm701_vm5, %v2838_v40, 0.0  ;;  %v2912_v35 = vsel %vm1209_vm15, 1.0, %v3457_v30  ;;  %v610_v40 = vmul.f32 %v1524_v28, %v2604_v51 }
 0x1a9   :  { %v1715_v21 = vpop.eup %1714  ;;  %v453_v49 = vmul.f32 1.442695, %v438_v4  ;;  %v2879_v6 = vadd.f32 %v749_v58, %v748_v63  ;;  %v1609_v58 = vsel %vm1292_vm13, 1.0, %v3457_v30  ;;  %v2924_v56 = vmul.f32 %v2912_v35, %v1197_v60 }
 0x1aa   :  { %483 = vadd.xlane.f32.xlu1 %v1715_v21  ;;  %vm1004_vm8 = vcmp.ge.f32.partialorder %v824_v55, 0.5  ;;  %v2873_v21 = vsel %vm651_vm4, 1.0, %v3457_v30  ;;  %v848_v15 = vmul.f32 %v824_v55, %v2734_v3  ;;  %vm1328_vm4 = vcmp.eq.f32.partialorder %v1561_v57, %v1609_v58 }
 0x1ab   :  { %1716 = vpow2.f32 %v453_v49  ;;  %3477 = vst [vmem:[#allocation40_spill] sm:$0xff] %v2873_v21  ;;  %v2877_v49 = vsel %vm790_vm7, 1.0, %v3457_v30  ;;  %v1573_v23 = vsel %vm1004_vm8, 1.0, %v3457_v30  ;;  %v1562_v60 = vsel %vm969_vm3, 1.0, %v3457_v30 }
 0x1ac   :  { %1718 = vpow2.f32 %v902_v41  ;;  %v2870_v41 = vsel %vm789_vm1, 1.0, %v3457_v30  ;;  %3478 = vst [vmem:[#allocation41_spill] sm:$0xff] %v2877_v49  ;;  %vm1040_vm2 = vcmp.eq.f32.partialorder %v1561_v57, %v1573_v23  ;;  %vm970_vm1 = vcmp.ge.f32.partialorder %v2736_v20, 0.0 }
 0x1ad   :  { %v825_v63 = vmul.f32 %v2870_v41, %v777_v31  ;;  %v836_v31 = vmax.f32 %v2734_v3, 0.0  ;;  %v2938_v59 = vsel %vm970_vm1, 1.0, %v3457_v30  ;;  %vm1293_vm7 = vcmp.ge.f32.partialorder %v2924_v56, 0.5 }
 0x1ae   :  { %v2889_v14 = vpop.xlane.xlu2 %427  ;;  %v906_v45 = vmul.f32 1.442695, %v886_v26  ;;  %v1610_v5 = vsel %vm1293_vm7, 1.0, %v3457_v30 }
 0x1af   :  { %3479 = vst [vmem:[#allocation42_spill] sm:$0xff] %v2889_v14  ;;  %vm1005_vm6 = vcmp.ge.f32.partialorder %v825_v63, 0.5  ;;  %v2921_v55 = vpop.xlane.xlu1 %413  ;;  %v2971_v33 = vsub.f32 %v836_v31, %v848_v15  ;;  %vm1329_vm12 = vcmp.eq.f32.partialorder %v1562_v60, %v1610_v5 }
 0x1b0   :  { %3482 = vst [vmem:[#allocation44_spill] sm:$0xff] %v2921_v55  ;;  %v436_v22 = vsub.f32 %v2615_v16, %v2921_v55  ;;  %v3484_v16 = vld [vmem:[#allocation19_spill] sm:$0xff] }
 0x1b1   :  { %v1717_v12 = vpop.eup %1716 }
 0x1b2   :  { %v1719_v4 = vpop.eup %1718  ;;  %477 = vadd.xlane.f32.xlu2 %v1717_v12  ;;  %v1198_v12 = vld [vmem:[%s3362_s6 + $0x40] sm:$0xff]  ;;  %v449_v61 = vmul.f32 1.442695, %v436_v22 }
 0x1b3   :  { %v920_v25 = vadd.f32 1.0, %v1719_v4  ;;  %v2907_v4 = vmul.f32 %v2877_v49, %v778_v10  ;;  %vm1210_vm14 = vcmp.ne.f32.partialorder %v1198_v12, -100.0  ;;  %v3481_v10 = vld [vmem:[#allocation23_spill] sm:$0xff] }
 0x1b4   :  { %v2932_v28 = vsel %vm1210_vm14, 1.0, %v3457_v30 }
 0x1b5   :  { %1720 = vlog2.f32 %v920_v25  ;;  %vm1006_vm0 = vcmp.ge.f32.partialorder %v2907_v4, 0.5  ;;  %3483 = vst [vmem:[#allocation45_spill] sm:$0xff] %v2932_v28  ;;  %v2950_v34 = vmul.f32 %v2932_v28, %v1198_v12  ;;  %v1621_v12 = vsel %vm1328_vm4, 1.0, %v3457_v30 }
 0x1b6   :  { %v2915_v8 = vpop.xlane.xlu0 %429  ;;  %1722 = vpow2.f32 %v904_v27  ;;  %v1575_v47 = vsel %vm1006_vm0, 1.0, %v3457_v30  ;;  %v2952_v22 = vpop.xlane.xlu2 %421  ;;  %v1529_v27 = vsel %vm579_vm10, 1.0, %v3457_v30  ;;  %v2986_v23 = vmul.f32 %v1621_v12, %v2827_v24 }
 0x1b7   :  { %3480 = vst [vmem:[#allocation43_spill] sm:$0xff] %v2915_v8  ;;  %v444_v2 = vsub.f32 %v3481_v10, %v2915_v8  ;;  %v1574_v8 = vsel %vm1005_vm6, 1.0, %v3457_v30  ;;  %vm1042_vm8 = vcmp.eq.f32.partialorder %v2938_v59, %v1575_v47  ;;  %v2975_v13 = vpop.xlane.xlu1 %425 }
 0x1b8   :  { %3486 = vst [vmem:[#allocation19_spill] sm:$0xff] %v2952_v22  ;;  %v442_v26 = vsub.f32 %v2511_v19, %v2975_v13  ;;  %v1587_v57 = vsel %vm1042_vm8, 1.0, %v3457_v30 }
 0x1b9   :  { %v465_v25 = vmul.f32 1.442695, %v444_v2  ;;  %v2946_v2 = vsel %vm575_vm9, 1.0, %v3457_v30  ;;  %vm1041_vm9 = vcmp.eq.f32.partialorder %v1562_v60, %v1574_v8  ;;  %3488 = vst [vmem:[#allocation5_spill] sm:$0xff] %v2975_v13  ;;  %v1199_v60 = vld [vmem:[%s3362_s6 + $0x48] sm:$0xff] }
 0x1ba   :  { %627 = vadd.xlane.f32.xlu2 %v610_v40  ;;  %v443_v40 = vsub.f32 %v3484_v16, %v2889_v14  ;;  %v1256_v14 = vmul.f32 %v2848_v62, %v2734_v3  ;;  %v849_v3 = vmul.f32 %v825_v63, %v2810_v50  ;;  %v1586_v8 = vsel %vm1041_vm9, 1.0, %v3457_v30  ;;  %v780_v63 = vld [vmem:[%s3361_s5 + $0x50] sm:$0xff] }
 0x1bb   :  { %1724 = vpow2.f32 %v465_v25  ;;  %v1721_v29 = vpop.eup %1720  ;;  %v2958_v25 = vsel %vm577_vm11, 1.0, %v3457_v30  ;;  %vm1294_vm11 = vcmp.ge.f32.partialorder %v2950_v34, 0.5  ;;  %v461_v13 = vmul.f32 1.442695, %v442_v26  ;;  %v781_v26 = vld [vmem:[%s3361_s5 + $0x58] sm:$0xff] }
 0x1bc   :  { %1726 = vpow2.f32 %v449_v61  ;;  %v1585_v61 = vsel %vm1040_vm2, 1.0, %v3457_v30  ;;  %v1723_v11 = vpop.eup %1722  ;;  %v463_v39 = vmul.f32 1.442695, %v443_v40  ;;  %v2983_v15 = vsub.f32 %v836_v31, %v1256_v14 }
 0x1bd   :  { %v1076_v62 = vmul.f32 %v1585_v61, %v2821_v1  ;;  %v921_v40 = vadd.f32 1.0, %v1723_v11  ;;  %1728 = vpow2.f32 %v906_v45  ;;  %v2994_v61 = vmul.f32 0.6931472, %v1721_v29  ;;  %v1200_v29 = vld [vmem:[%s3362_s6 + $0x50] sm:$0xff] }
 0x1be   :  { %v2992_v0 = vpop.xlane.xlu0 %394  ;;  %v1611_v14 = vsel %vm1294_vm11, 1.0, %v3457_v30  ;;  %1730 = vpow2.f32 %v463_v39  ;;  %v1077_v31 = vmul.f32 %v1586_v8, %v2870_v41  ;;  %v3489_v45 = vmax.f32 %v2810_v50, 0.0  ;;  %v1793_v8 = vld [vmem:[%s3360_s4 + $0x58] sm:$0xff] }
 0x1bf   :  { %v440_v11 = vsub.f32 %v2604_v51, %v2952_v22  ;;  %1732 = vpow2.f32 %v461_v13  ;;  %v1078_v39 = vmul.f32 %v1587_v57, %v2877_v49  ;;  %vm652_vm13 = vcmp.ne.s32.totalorder %v1793_v8, 4294967196  ;;  %v3027_v57 = vpop.xlane.xlu2 %397  ;;  %v3032_v5 = vpop.xlane.xlu1 %433 }
 0x1c0   :  { %v3002_v12 = vsub.f32 %v3489_v45, %v849_v3  ;;  %v3018_v3 = vmul.f32 %v2924_v56, %v2810_v50  ;;  %v1622_v51 = vsel %vm1329_vm12, 1.0, %v3457_v30  ;;  %vm792_vm15 = vcmp.ne.f32.partialorder %v780_v63, -100.0  ;;  %v3490_v56 = vld [vmem:[#allocation20_spill] sm:$0xff]  ;;  %3491 = vst [vmem:[#allocation6_spill] sm:$0xff] %v3032_v5 }
 0x1c1   :  { %v1725_v47 = vpop.eup %1724  ;;  %v876_v13 = vand.u32 2147483647, %v2992_v0  ;;  %1734 = vlog2.f32 %v921_v40  ;;  %vm1330_vm10 = vcmp.eq.f32.partialorder %v2938_v59, %v1611_v14  ;;  %v615_v45 = vmul.f32 %v1529_v27, %v3490_v56 }
 0x1c2   :  { %v1727_v58 = vpop.eup %1726  ;;  %489 = vadd.xlane.f32.xlu2 %v1725_v47  ;;  %v779_v47 = vld [vmem:[%s3361_s5 + $0x48] sm:$0xff]  ;;  %vm1212_vm2 = vcmp.ne.f32.partialorder %v1200_v29, -100.0  ;;  %vm793_vm14 = vcmp.ne.f32.partialorder %v781_v26, -100.0  ;;  %v3038_v22 = vsel %vm701_vm5, %v1076_v62, 0.0  ;;  %v3041_v40 = vsel %vm701_vm5, %v1077_v31, 0.0 }
 0x1c3   :  { %473 = vadd.xlane.f32.xlu0 %v1727_v58  ;;  %v612_v58 = vmul.f32 %v2901_v37, %v2511_v19  ;;  %v1729_v46 = vpop.eup %1728  ;;  %v457_v43 = vmul.f32 1.442695, %v440_v11  ;;  %v3045_v19 = vsel %vm792_vm15, 1.0, %v3457_v30  ;;  %v1201_v37 = vld [vmem:[%s3362_s6 + $0x58] sm:$0xff]  ;;  %vm791_vm6 = vcmp.ne.f32.partialorder %v779_v47, -100.0 }
 0x1c4   :  { %3492 = vst [vmem:[#allocation20_spill] sm:$0xff] %v3045_v19  ;;  %v3051_v27 = vsel %vm701_vm5, %v1078_v39, 0.0  ;;  %v1731_v55 = vpop.eup %1730  ;;  %v888_v62 = vsub.f32 0.0, %v876_v13  ;;  %v877_v44 = vand.u32 2147483647, %v3027_v57  ;;  %v1623_v31 = vsel %vm1330_vm10, 1.0, %v3457_v30 }
 0x1c5   :  { %v1365_v11 = vmul.f32 %v1622_v51, %v2912_v35  ;;  %v1733_v52 = vpop.eup %1732  ;;  %v3060_v42 = vsel %vm1212_vm2, 1.0, %v3457_v30  ;;  %v3064_v10 = vsel %vm793_vm14, 1.0, %v3457_v30  ;;  %vm1211_vm3 = vcmp.ne.f32.partialorder %v1199_v60, -100.0 }
 0x1c6   :  { %v752_v39 = vadd.f32 %v2866_v36, %v2879_v6  ;;  %v3069_v13 = vmul.f32 %v3045_v19, %v780_v63  ;;  %vm1213_vm0 = vcmp.ne.f32.partialorder %v1201_v37, -100.0  ;;  %v446_v59 = vsub.f32 %v2685_v7, %v3032_v5  ;;  %485 = vadd.xlane.f32.xlu1 %v1733_v52 }
 0x1c7   :  { %v3075_v14 = vsel %vm791_vm6, 1.0, %v3457_v30  ;;  %v3077_v51 = vpop.eup %1734  ;;  %1736 = vpow2.f32 %v457_v43  ;;  %v3080_v49 = vmul.f32 %v1623_v31, %v2932_v28  ;;  %v1457_v36 = vsel %vm701_vm5, %v2986_v23, 0.0 }
 0x1c8   :  { %v910_v6 = vmul.f32 1.442695, %v888_v62  ;;  %v3085_v63 = vmul.f32 %v3064_v10, %v781_v26  ;;  %v889_v52 = vsub.f32 0.0, %v877_v44  ;;  %v3092_v5 = vmul.f32 %v3060_v42, %v1200_v29  ;;  %v3102_v62 = vpop.xlane.xlu1 %419 }
 0x1c9   :  { %v3098_v43 = vmul.f32 %v3075_v14, %v779_v47  ;;  %v754_v23 = vadd.f32 %v2883_v48, %v752_v39  ;;  %vm972_vm1 = vcmp.ge.f32.partialorder %v2992_v0, 0.0  ;;  %v469_v26 = vmul.f32 1.442695, %v446_v59  ;;  %3493 = vst [vmem:[#allocation46_spill] sm:$0xff] %v3102_v62 }
 0x1ca   :  { %631 = vadd.xlane.f32.xlu2 %v612_v58  ;;  %v922_v58 = vadd.f32 1.0, %v1729_v46  ;;  %v3095_v46 = vsel %vm1213_vm0, 1.0, %v3457_v30  ;;  %v755_v44 = vsel %vm701_vm5, %v2873_v21, 0.0  ;;  %vm1008_vm4 = vcmp.ge.f32.partialorder %v3069_v13, 0.5 }
 0x1cb   :  { %487 = vadd.xlane.f32.xlu0 %v1731_v55  ;;  %v3089_v55 = vsel %vm1211_vm3, 1.0, %v3457_v30  ;;  %v439_v29 = vsub.f32 %v2544_v54, %v3102_v62  ;;  %v3114_v47 = vsel %vm652_vm13, 1.0, %v3457_v30  ;;  %vm973_vm7 = vcmp.ge.f32.partialorder %v3027_v57, 0.0 }
 0x1cc   :  { %v3110_v31 = vmul.f32 %v3089_v55, %v1199_v60  ;;  %3494 = vst [vmem:[#allocation47_spill] sm:$0xff] %v3114_v47  ;;  %v445_v48 = vsub.f32 %v3490_v56, %v2854_v53  ;;  %1738 = vpow2.f32 %v910_v6  ;;  %v912_v39 = vmul.f32 1.442695, %v889_v52 }
 0x1cd   :  { %vm1009_vm9 = vcmp.ge.f32.partialorder %v3085_v63, 0.5  ;;  %v1737_v59 = vpop.eup %1736  ;;  %v455_v21 = vmul.f32 1.442695, %v439_v29  ;;  %v756_v54 = vadd.f32 %v755_v44, %v754_v23  ;;  %v3123_v60 = vsel %vm972_vm1, 1.0, %v3457_v30 }
 0x1ce   :  { %v1577_v8 = vsel %vm1008_vm4, 1.0, %v3457_v30  ;;  %v3127_v62 = vmul.f32 %v3095_v46, %v1201_v37  ;;  %1740 = vpow2.f32 %v469_v26  ;;  %v757_v56 = vsel %vm701_vm5, %v3114_v47, 0.0 }
 0x1cf   :  { %v3132_v6 = vsel %vm973_vm7, 1.0, %v3457_v30  ;;  %1742 = vpow2.f32 %v455_v21  ;;  %vm1007_vm8 = vcmp.ge.f32.partialorder %v3098_v43, 0.5  ;;  %vm1295_vm11 = vcmp.ge.f32.partialorder %v3110_v31, 0.5 }
 0x1d0   :  { %3495 = vst [vmem:[#allocation48_spill] sm:$0xff] %v3127_v62  ;;  %1744 = vlog2.f32 %v922_v58  ;;  %v467_v52 = vmul.f32 1.442695, %v445_v48  ;;  %vm1044_vm12 = vcmp.eq.f32.partialorder %v3123_v60, %v1577_v8  ;;  %v1170_v37 = vadd.f32 %v3038_v22, %v2696_v38  ;;  %v3142_v44 = vpop.xlane.xlu1 %391 }
 0x1d1   :  { %1746 = vpow2.f32 %v912_v39  ;;  %v758_v23 = vadd.f32 %v757_v56, %v756_v54  ;;  %vm1296_vm13 = vcmp.ge.f32.partialorder %v3092_v5, 0.5  ;;  %v1459_v26 = vsel %vm701_vm5, %v1365_v11, 0.0  ;;  %v3496_v11 = vld [vmem:[#allocation7_spill] sm:$0xff]  ;;  %v3497_v39 = vld [vmem:[#allocation12_spill] sm:$0xff] }
 0x1d2   :  { %637 = vadd.xlane.f32.xlu2 %v615_v45  ;;  %v1578_v45 = vsel %vm1009_vm9, 1.0, %v3457_v30  ;;  %v1739_v21 = vpop.eup %1738  ;;  %v1576_v29 = vsel %vm1007_vm8, 1.0, %v3457_v30  ;;  %v1172_v58 = vadd.f32 %v3041_v40, %v1170_v37  ;;  %v1612_v48 = vsel %vm1295_vm11, 1.0, %v3457_v30 }
 0x1d3   :  { %481 = vadd.xlane.f32.xlu0 %v1737_v59  ;;  %vm1045_vm15 = vcmp.eq.f32.partialorder %v3132_v6, %v1578_v45  ;;  %v875_v59 = vand.u32 2147483647, %v3142_v44  ;;  %vm971_vm10 = vcmp.ge.f32.partialorder %v3142_v44, 0.0  ;;  %v1589_v38 = vsel %vm1044_vm12, 1.0, %v3457_v30 }
 0x1d4   :  { %vm1297_vm2 = vcmp.ge.f32.partialorder %v3127_v62, 0.5  ;;  %v1741_v22 = vpop.eup %1740  ;;  %vm580_vm14 = vcmp.eq.s32.totalorder %v2325_v32, %v3496_v11  ;;  %vm578_vm6 = vcmp.eq.s32.totalorder %v2325_v32, %v3497_v39  ;;  %1748 = vpow2.f32 %v467_v52 }
 0x1d5   :  { %v1564_v40 = vsel %vm971_vm10, 1.0, %v3457_v30  ;;  %v1613_v54 = vsel %vm1296_vm13, 1.0, %v3457_v30  ;;  %v1458_v8 = vadd.f32 %v1457_v36, %v2713_v17  ;;  %v1743_v56 = vpop.eup %1742  ;;  %v887_v37 = vsub.f32 0.0, %v875_v59 }
 0x1d6   :  { %vm1043_vm3 = vcmp.eq.f32.partialorder %v1564_v40, %v1576_v29  ;;  %v1590_v47 = vsel %vm1045_vm15, 1.0, %v3457_v30  ;;  %vm1331_vm0 = vcmp.eq.f32.partialorder %v1564_v40, %v1612_v48  ;;  %v1745_v53 = vpop.eup %1744  ;;  %479 = vadd.xlane.f32.xlu1 %v1743_v56  ;;  %v1080_v28 = vmul.f32 %v1589_v38, %v3045_v19 }
 0x1d7   :  { %v1588_v52 = vsel %vm1043_vm3, 1.0, %v3457_v30  ;;  %v1614_v17 = vsel %vm1297_vm2, 1.0, %v3457_v30  ;;  %v1624_v36 = vsel %vm1331_vm0, 1.0, %v3457_v30  ;;  %v908_v29 = vmul.f32 1.442695, %v887_v37 }
 0x1d8   :  { %v1079_v59 = vmul.f32 %v1588_v52, %v3075_v14  ;;  %vm1332_vm1 = vcmp.eq.f32.partialorder %v3123_v60, %v1613_v54  ;;  %v1367_v45 = vmul.f32 %v1624_v36, %v3089_v55  ;;  %v838_v48 = vmax.f32 %v2736_v20, 0.0 }
 0x1d9   :  { %v1174_v40 = vadd.f32 %v3051_v27, %v1172_v58  ;;  %v1460_v38 = vadd.f32 %v1459_v26, %v1458_v8  ;;  %v850_v56 = vmul.f32 %v2907_v4, %v2736_v20  ;;  %1750 = vpow2.f32 %v908_v29 }
 0x1da   :  { %759 = vadd.xlane.f32.xlu2 %v758_v23  ;;  %v1747_v23 = vpop.eup %1746  ;;  %v1081_v19 = vmul.f32 %v1590_v47, %v3064_v10  ;;  %v1175_v37 = vsel %vm701_vm5, %v1079_v59, 0.0  ;;  %vm1333_vm4 = vcmp.eq.f32.partialorder %v3132_v6, %v1614_v17  ;;  %v1625_v60 = vsel %vm1332_vm1, 1.0, %v3457_v30 }
 0x1db   :  { %493 = vadd.xlane.f32.xlu0 %v1741_v22  ;;  %v924_v22 = vadd.f32 1.0, %v1739_v21  ;;  %v1749_v62 = vpop.eup %1748  ;;  %v1176_v52 = vadd.f32 %v1175_v37, %v1174_v40  ;;  %v925_v54 = vadd.f32 1.0, %v1747_v23  ;;  %v941_v21 = vmul.f32 0.6931472, %v3077_v51 }
 0x1dc   :  { %v1177_v27 = vsel %vm701_vm5, %v1080_v28, 0.0  ;;  %v1461_v26 = vsel %vm701_vm5, %v3080_v49, 0.0  ;;  %v1463_v4 = vsel %vm701_vm5, %v1367_v45, 0.0  ;;  %v613_v47 = vmul.f32 %v2958_v25, %v3484_v16 }
 0x1dd   :  { %v1178_v58 = vadd.f32 %v1177_v27, %v1176_v52  ;;  %v1462_v8 = vadd.f32 %v1461_v26, %v1460_v38  ;;  %1752 = vlog2.f32 %v924_v22  ;;  %v1258_v6 = vmul.f32 %v2950_v34, %v2736_v20 }
 0x1de   :  { %v1179_v17 = vsel %vm701_vm5, %v1081_v19, 0.0  ;;  %v1626_v51 = vsel %vm1333_vm4, 1.0, %v3457_v30  ;;  %v1368_v28 = vmul.f32 %v1625_v60, %v3060_v42  ;;  %v956_v49 = vadd.f32 %v2994_v61, %v2971_v33  ;;  %491 = vadd.xlane.f32.xlu1 %v1749_v62 }
 0x1df   :  { %v1180_v36 = vadd.f32 %v1179_v17, %v1178_v58  ;;  %v1464_v23 = vadd.f32 %v1463_v4, %v1462_v8  ;;  %1754 = vlog2.f32 %v925_v54  ;;  %v1751_v16 = vpop.eup %1750  ;;  %v1530_v20 = vsel %vm580_vm14, 1.0, %v3457_v30  ;;  %v3499_v58 = vld [vmem:[#allocation41_spill] sm:$0xff] }
 0x1e0   :  { %v1528_v34 = vsel %vm578_vm6, 1.0, %v3457_v30  ;;  %v1280_v25 = vadd.f32 %v2983_v15, %v2994_v61  ;;  %v957_v33 = vadd.f32 %v941_v21, %v3002_v12  ;;  %v3498_v19 = vmax.f32 %v2810_v50, 0.0 }
 0x1e1   :  { %v943_v29 = vmul.f32 0.6931472, %v1745_v53  ;;  %v923_v59 = vadd.f32 1.0, %v1751_v16  ;;  %v1369_v11 = vmul.f32 %v1626_v51, %v3095_v46  ;;  %v862_v45 = vsub.f32 %v838_v48, %v850_v56 }
 0x1e2   :  { %v1269_v62 = vsub.f32 %v3498_v19, %v3018_v3  ;;  %1181 = vadd.xlane.f32.xlu2 %v1180_v36  ;;  %v1270_v22 = vsub.f32 %v838_v48, %v1258_v6  ;;  %v611_v32 = vmul.f32 %v2946_v2, %v2475_v18  ;;  %v1465_v30 = vsel %vm701_vm5, %v1368_v28, 0.0  ;;  %v3500_v36 = vld [vmem:[#allocation23_spill] sm:$0xff] }
 0x1e3   :  { %633 = vadd.xlane.f32.xlu0 %v613_v47  ;;  %v1753_v39 = vpop.eup %1752  ;;  %1756 = vlog2.f32 %v923_v59  ;;  %v1466_v61 = vadd.f32 %v1465_v30, %v1464_v23  ;;  %v1088_v12 = vmul.f32 %v2821_v1, %v956_v49  ;;  %v840_v50 = vmax.f32 %v2992_v0, 0.0 }
 0x1e4   :  { %v1281_v15 = vadd.f32 %v1269_v62, %v941_v21  ;;  %v852_v53 = vmul.f32 %v3069_v13, %v2992_v0  ;;  %v616_v3 = vmul.f32 %v1530_v20, %v2685_v7  ;;  %v1089_v48 = vmul.f32 %v2870_v41, %v957_v33 }
 0x1e5   :  { %v1755_v40 = vpop.eup %1754  ;;  %v841_v18 = vmax.f32 %v3027_v57, 0.0  ;;  %v853_v2 = vmul.f32 %v3085_v63, %v3027_v57  ;;  %v1467_v38 = vsel %vm701_vm5, %v1369_v11, 0.0  ;;  %v958_v56 = vadd.f32 %v943_v29, %v862_v45  ;;  %v3503_v11 = vld [vmem:[#allocation24_spill] sm:$0xff] }
 0x1e6   :  { %v839_v37 = vmax.f32 %v3142_v44, 0.0  ;;  %v851_v52 = vmul.f32 %v3098_v43, %v3142_v44  ;;  %v1259_v13 = vmul.f32 %v3110_v31, %v3142_v44  ;;  %v947_v7 = vmul.f32 0.6931472, %v1753_v39  ;;  %629 = vadd.xlane.f32.xlu1 %v611_v32 }
 0x1e7   :  { %v1468_v60 = vadd.f32 %v1467_v38, %v1466_v61  ;;  %v1105_v54 = vsel %vm701_vm5, %v1088_v12, 0.0  ;;  %v1376_v21 = vmul.f32 %v2827_v24, %v1280_v25  ;;  %v1377_v63 = vmul.f32 %v2912_v35, %v1281_v15 }
 0x1e8   :  { %v864_v27 = vsub.f32 %v840_v50, %v852_v53  ;;  %v949_v26 = vmul.f32 0.6931472, %v1755_v40  ;;  %v1106_v4 = vadd.f32 %v1105_v54, %v2723_v9  ;;  %v1107_v47 = vsel %vm701_vm5, %v1089_v48, 0.0 }
 0x1e9   :  { %v1757_v43 = vpop.eup %1756  ;;  %v1260_v31 = vmul.f32 %v3092_v5, %v2992_v0  ;;  %v865_v44 = vsub.f32 %v841_v18, %v853_v2  ;;  %v1090_v8 = vmul.f32 %v3499_v58, %v958_v56  ;;  %v1282_v6 = vadd.f32 %v1270_v22, %v943_v29  ;;  %v3501_v0 = vld [vmem:[#allocation48_spill] sm:$0xff]  ;;  %v3502_v29 = vld [vmem:[#allocation45_spill] sm:$0xff] }
 0x1ea   :  { %1469 = vadd.xlane.f32.xlu2 %v1468_v60  ;;  %v863_v17 = vsub.f32 %v839_v37, %v851_v52  ;;  %v1271_v51 = vsub.f32 %v839_v37, %v1259_v13  ;;  %v945_v28 = vmul.f32 0.6931472, %v1757_v43  ;;  %v960_v49 = vadd.f32 %v947_v7, %v864_v27 }
 0x1eb   :  { %639 = vadd.xlane.f32.xlu0 %v616_v3  ;;  %v614_v23 = vmul.f32 %v1528_v34, %v3500_v36  ;;  %v1108_v16 = vadd.f32 %v1107_v47, %v1106_v4  ;;  %v1393_v9 = vsel %vm701_vm5, %v1376_v21, 0.0  ;;  %v961_v25 = vadd.f32 %v949_v26, %v865_v44  ;;  %v3504_v34 = vld [vmem:[#allocation20_spill] sm:$0xff]  ;;  %v618_v4 = vpop.xlane.xlu2 %617  ;;  %v620_v47 = vpop.xlane.xlu0 %619 }
 0x1ec   :  { %v959_v20 = vadd.f32 %v945_v28, %v863_v17  ;;  %v1283_v33 = vadd.f32 %v1271_v51, %v945_v28  ;;  %v1395_v19 = vsel %vm701_vm5, %v1377_v63, 0.0  ;;  %v1261_v5 = vmul.f32 %v3501_v0, %v3027_v57 }
 0x1ed   :  { %v1109_v62 = vsel %vm701_vm5, %v1090_v8, 0.0  ;;  %v1378_v59 = vmul.f32 %v3502_v29, %v1282_v6  ;;  %v1394_v45 = vadd.f32 %v1393_v9, %v3503_v11  ;;  %v1092_v32 = vmul.f32 %v3504_v34, %v960_v49  ;;  %v3506_v9 = vld [vmem:[#allocation13_spill] sm:$0xff]  ;;  %v3508_v11 = vld [vmem:[#allocation15_spill] sm:$0xff] }
 0x1ee   :  { %v1091_v22 = vmul.f32 %v3075_v14, %v959_v20  ;;  %v1272_v30 = vsub.f32 %v840_v50, %v1260_v31  ;;  %v1379_v39 = vmul.f32 %v3089_v55, %v1283_v33  ;;  %635 = vadd.xlane.f32.xlu1 %v614_v23  ;;  %v1110_v15 = vadd.f32 %v1109_v62, %v1108_v16  ;;  %v3259_v31 = vpop.xlane.xlu1 %623  ;;  %v3505_v23 = vld [vmem:[#allocation8_spill] sm:$0xff] }
 0x1ef   :  { %v1396_v61 = vadd.f32 %v1395_v19, %v1394_v45  ;;  %v1093_v12 = vmul.f32 %v3064_v10, %v961_v25  ;;  %v1113_v48 = vsel %vm701_vm5, %v1092_v32, 0.0  ;;  %v1273_v40 = vsub.f32 %v841_v18, %v1261_v5  ;;  %v3507_v5 = vld [vmem:[#allocation10_spill] sm:$0xff] }
 0x1f0   :  { %v1111_v57 = vsel %vm701_vm5, %v1091_v22, 0.0  ;;  %v1284_v53 = vadd.f32 %v1272_v30, %v947_v7  ;;  %v1397_v2 = vsel %vm701_vm5, %v1378_v59, 0.0  ;;  %v1399_v38 = vsel %vm701_vm5, %v1379_v39, 0.0  ;;  %v3509_v22 = vld [vmem:[#allocation44_spill] sm:$0xff] }
 0x1f1   :  { %v1112_v3 = vadd.f32 %v1111_v57, %v1110_v15  ;;  %v1398_v50 = vadd.f32 %v1397_v2, %v1396_v61  ;;  %v1115_v37 = vsel %vm701_vm5, %v1093_v12, 0.0  ;;  %v1285_v52 = vadd.f32 %v1273_v40, %v949_v26  ;;  %v3510_v15 = vld [vmem:[#allocation25_spill] sm:$0xff] }
 0x1f2   :  { %v1380_v13 = vmul.f32 %v3060_v42, %v1284_v53  ;;  %v1126_v16 = vsel %vm701_vm5, %v3505_v23, 0.0  ;;  %v1127_v20 = vsel %vm701_vm5, %v3506_v9, 0.0  ;;  %v1129_v62 = vsel %vm701_vm5, %v3507_v5, 0.0  ;;  %v3511_v53 = vld [vmem:[#allocation17_spill] sm:$0xff] }
 0x1f3   :  { %v1114_v56 = vadd.f32 %v1113_v48, %v1112_v3  ;;  %v1400_v54 = vadd.f32 %v1399_v38, %v1398_v50  ;;  %v1381_v7 = vmul.f32 %v3095_v46, %v1285_v52  ;;  %v3257_v43 = vpop.xlane.xlu2 %621  ;;  %v3261_v26 = vpop.xlane.xlu0 %625  ;;  %v1128_v33 = vadd.f32 %v1127_v20, %v1126_v16  ;;  %v3512_v38 = vld [vmem:[#allocation21_spill] sm:$0xff] }
 0x1f4   :  { %v1401_v21 = vsel %vm701_vm5, %v1380_v13, 0.0  ;;  %v1131_v45 = vsel %vm701_vm5, %v3508_v11, 0.0  ;;  %v1133_v3 = vsel %vm701_vm5, %v3511_v53, 0.0  ;;  %v1141_v16 = vsel %vm701_vm5, %v3499_v58, 0.0 }
 0x1f5   :  { %v1116_v60 = vadd.f32 %v1115_v37, %v1114_v56  ;;  %v1402_v63 = vadd.f32 %v1401_v21, %v1400_v54  ;;  %v1403_v18 = vsel %vm701_vm5, %v1381_v7, 0.0  ;;  %v1130_v57 = vadd.f32 %v1129_v62, %v1128_v33  ;;  %v3513_v37 = vld [vmem:[#allocation26_spill] sm:$0xff]  ;;  %v3517_v33 = vld [vmem:[#allocation29_spill] sm:$0xff]  ;;  %v3518_v62 = vld [vmem:[#allocation19_spill] sm:$0xff] }
 0x1f6   :  { %v1135_v56 = vsel %vm701_vm5, %v3512_v38, 0.0  ;;  %v1137_v54 = vsel %vm701_vm5, %v2821_v1, 0.0  ;;  %v1145_v58 = vsel %vm701_vm5, %v3504_v34, 0.0 }
 0x1f7   :  { %1117 = vadd.xlane.f32.xlu0 %v1116_v60  ;;  %v1404_v27 = vadd.f32 %v1403_v18, %v1402_v63  ;;  %v1132_v40 = vadd.f32 %v1131_v45, %v1130_v57  ;;  %v3514_v63 = vld [vmem:[#allocation28_spill] sm:$0xff]  ;;  %v3519_v45 = vld [vmem:[#allocation9_spill] sm:$0xff] }
 0x1f9   :  { %v1134_v13 = vadd.f32 %v1133_v3, %v1132_v40  ;;  %v3521_v3 = vld [vmem:[#allocation30_spill] sm:$0xff]  ;;  %v3522_v40 = vld [vmem:[#allocation5_spill] sm:$0xff] }
 0x1fb   :  { %v1136_v21 = vadd.f32 %v1135_v56, %v1134_v13  ;;  %v3523_v56 = vld [vmem:[#allocation46_spill] sm:$0xff] }
 0x1ff   :  { %1405 = vadd.xlane.f32.xlu0 %v1404_v27 }
 0x211   :  { %v472_v8 = vpop.xlane.xlu1 %471 }
 0x214   :  { %v476_v44 = vpop.xlane.xlu2 %475 }
 0x21d   :  { %v484_v51 = vpop.xlane.xlu1 %483 }
 0x225   :  { %v478_v17 = vpop.xlane.xlu2 %477 }
 0x22d   :  { %v3269_v59 = vpop.xlane.xlu2 %627 }
 0x236   :  { %v474_v6 = vpop.xlane.xlu0 %473 }
 0x237   :  { %1758 = vlog2.f32 %v474_v6  ;;  %v1138_v6 = vadd.f32 %v1137_v54, %v1136_v21  ;;  %v3524_v54 = vld [vmem:[#allocation11_spill] sm:$0xff] }
 0x238   :  { %1760 = vlog2.f32 %v472_v8 }
 0x239   :  { %1762 = vlog2.f32 %v476_v44  ;;  %v486_v30 = vpop.xlane.xlu1 %485  ;;  %v3515_v44 = vld [vmem:[#allocation27_spill] sm:$0xff] }
 0x23a   :  { %1764 = vlog2.f32 %v478_v17  ;;  %v3516_v17 = vld [vmem:[#allocation34_spill] sm:$0xff] }
 0x23d   :  { %v1759_v49 = vpop.eup %1758 }
 0x23e   :  { %v488_v28 = vpop.xlane.xlu0 %487  ;;  %v1761_v36 = vpop.eup %1760  ;;  %v498_v25 = vmul.f32 0.6931472, %v1759_v49 }
 0x23f   :  { %v496_v19 = vmul.f32 0.6931472, %v1761_v36  ;;  %v1763_v0 = vpop.eup %1762  ;;  %v490_v36 = vpop.xlane.xlu2 %489 }
 0x240   :  { %v520_v32 = vadd.f32 %v498_v25, %v3509_v22  ;;  %v500_v12 = vmul.f32 0.6931472, %v1763_v0  ;;  %v1765_v48 = vpop.eup %1764  ;;  %v1143_v25 = vsel %vm701_vm5, %v3075_v14, 0.0  ;;  %v1414_v22 = vsel %vm701_vm5, %v3519_v45, 0.0 }
 0x241   :  { %v519_v61 = vadd.f32 %v496_v19, %v3510_v15  ;;  %v502_v60 = vmul.f32 0.6931472, %v1765_v48 }
 0x242   :  { %v678_v2 = vsub.f32 %v520_v32, %v620_v47  ;;  %v521_v52 = vadd.f32 %v500_v12, %v3513_v37  ;;  %v1139_v47 = vsel %vm701_vm5, %v2870_v41, 0.0  ;;  %v1147_v12 = vsel %vm701_vm5, %v3064_v10, 0.0 }
 0x243   :  { %v677_v50 = vsub.f32 %v519_v61, %v618_v4  ;;  %v522_v49 = vadd.f32 %v502_v60, %v3516_v17  ;;  %v1140_v20 = vadd.f32 %v1139_v47, %v1138_v6  ;;  %v1417_v10 = vsel %vm701_vm5, %v3524_v54, 0.0  ;;  %v3525_v47 = vld [vmem:[#allocation16_spill] sm:$0xff]  ;;  %v3526_v6 = vld [vmem:[#allocation33_spill] sm:$0xff] }
 0x244   :  { %v690_v18 = vmul.f32 %v3514_v63, %v678_v2  ;;  %v679_v4 = vsub.f32 %v521_v52, %v3257_v43 }
 0x245   :  { %v689_v8 = vmul.f32 %v3515_v44, %v677_v50  ;;  %v1142_v19 = vadd.f32 %v1141_v16, %v1140_v20  ;;  %v680_v0 = vsub.f32 %v522_v49, %v3259_v31  ;;  %v1419_v44 = vsel %vm701_vm5, %v3525_v47, 0.0  ;;  %v3527_v49 = vld [vmem:[#allocation32_spill] sm:$0xff] }
 0x246   :  { %v482_v39 = vpop.xlane.xlu0 %481  ;;  %v703_v41 = vsel %vm701_vm5, %v690_v18, 0.0 }
 0x247   :  { %1766 = vlog2.f32 %v482_v39  ;;  %v702_v43 = vsel %vm701_vm5, %v689_v8, 0.0  ;;  %v1144_v14 = vadd.f32 %v1143_v25, %v1142_v19  ;;  %v3520_v39 = vld [vmem:[#allocation14_spill] sm:$0xff]  ;;  %v692_v48 = vmul.f32 %v3521_v3, %v680_v0  ;;  %v632_v21 = vpop.xlane.xlu2 %631 }
 0x248   :  { %1768 = vlog2.f32 %v486_v30  ;;  %v704_v32 = vadd.f32 %v703_v41, %v702_v43  ;;  %v1415_v15 = vsel %vm701_vm5, %v3520_v39, 0.0  ;;  %v3529_v43 = vld [vmem:[#allocation42_spill] sm:$0xff]  ;;  %v3533_v39 = vld [vmem:[#allocation35_spill] sm:$0xff] }
 0x249   :  { %v480_v27 = vpop.xlane.xlu1 %479  ;;  %v1146_v53 = vadd.f32 %v1145_v58, %v1144_v14  ;;  %v1416_v37 = vadd.f32 %v1415_v15, %v1414_v22  ;;  %v707_v8 = vsel %vm701_vm5, %v692_v48, 0.0  ;;  %v3531_v58 = vld [vmem:[#allocation36_spill] sm:$0xff]  ;;  %v3532_v14 = vld [vmem:[#allocation38_spill] sm:$0xff] }
 0x24a   :  { %1770 = vlog2.f32 %v480_v27 }
 0x24b   :  { %1772 = vlog2.f32 %v484_v51  ;;  %v691_v51 = vmul.f32 %v3517_v33, %v679_v4  ;;  %v1148_v60 = vadd.f32 %v1147_v12, %v1146_v53  ;;  %v1418_v20 = vadd.f32 %v1417_v10, %v1416_v37 }
 0x24c   :  { %1774 = vlog2.f32 %v488_v28  ;;  %v1425_v53 = vsel %vm701_vm5, %v2827_v24, 0.0  ;;  %v1427_v10 = vsel %vm701_vm5, %v2912_v35, 0.0 }
 0x24d   :  { %v1767_v7 = vpop.eup %1766  ;;  %1776 = vlog2.f32 %v490_v36  ;;  %v705_v34 = vsel %vm701_vm5, %v691_v51, 0.0  ;;  %1149 = vadd.xlane.f32.xlu1 %v1148_v60  ;;  %v3537_v60 = vld [vmem:[#allocation6_spill] sm:$0xff] }
 0x24e   :  { %v506_v23 = vmul.f32 0.6931472, %v1767_v7  ;;  %v494_v1 = vpop.xlane.xlu0 %493  ;;  %v1769_v9 = vpop.eup %1768  ;;  %v706_v13 = vadd.f32 %v705_v34, %v704_v32 }
 0x24f   :  { %v510_v5 = vmul.f32 0.6931472, %v1769_v9  ;;  %1778 = vlog2.f32 %v494_v1  ;;  %v3528_v1 = vld [vmem:[#allocation31_spill] sm:$0xff]  ;;  %v638_v48 = vpop.xlane.xlu2 %637 }
 0x250   :  { %v524_v11 = vadd.f32 %v506_v23, %v3518_v62  ;;  %v1771_v28 = vpop.eup %1770  ;;  %v708_v9 = vadd.f32 %v707_v8, %v706_v13  ;;  %v3530_v62 = vld [vmem:[#allocation18_spill] sm:$0xff] }
 0x251   :  { %v1773_v30 = vpop.eup %1772  ;;  %v504_v61 = vmul.f32 0.6931472, %v1771_v28  ;;  %v492_v31 = vpop.xlane.xlu1 %491  ;;  %v526_v2 = vadd.f32 %v510_v5, %v3522_v40  ;;  %v1420_v5 = vadd.f32 %v1419_v44, %v1418_v20 }
 0x252   :  { %v1775_v57 = vpop.eup %1774  ;;  %1780 = vlog2.f32 %v492_v31  ;;  %v682_v38 = vsub.f32 %v524_v11, %v3269_v59  ;;  %v508_v52 = vmul.f32 0.6931472, %v1773_v30  ;;  %v1421_v11 = vsel %vm701_vm5, %v3530_v62, 0.0  ;;  %v3534_v31 = vld [vmem:[#allocation22_spill] sm:$0xff] }
 0x253   :  { %v523_v50 = vadd.f32 %v504_v61, %v3523_v56  ;;  %v512_v7 = vmul.f32 0.6931472, %v1775_v57  ;;  %v1777_v27 = vpop.eup %1776  ;;  %v684_v4 = vsub.f32 %v526_v2, %v632_v21  ;;  %v1423_v12 = vsel %vm701_vm5, %v3534_v31, 0.0 }
 0x254   :  { %v694_v17 = vmul.f32 %v3526_v6, %v682_v38  ;;  %v525_v16 = vadd.f32 %v508_v52, %v3528_v1  ;;  %v1422_v57 = vadd.f32 %v1421_v11, %v1420_v5  ;;  %v3535_v38 = vld [vmem:[#allocation43_spill] sm:$0xff]  ;;  %v3536_v52 = vld [vmem:[#allocation37_spill] sm:$0xff]  ;;  %v1431_v1 = vsel %vm701_vm5, %v3089_v55, 0.0 }
 0x255   :  { %v681_v63 = vsub.f32 %v523_v50, %v3261_v26  ;;  %v1779_v59 = vpop.eup %1778  ;;  %v514_v26 = vmul.f32 0.6931472, %v1777_v27  ;;  %v527_v33 = vadd.f32 %v512_v7, %v3529_v43  ;;  %v696_v28 = vmul.f32 %v3531_v58, %v684_v4  ;;  %v3539_v4 = vld [vmem:[#allocation40_spill] sm:$0xff] }
 0x256   :  { %v634_v18 = vpop.xlane.xlu0 %633  ;;  %v518_v45 = vmul.f32 0.6931472, %v1779_v59  ;;  %v711_v32 = vsel %vm701_vm5, %v694_v17, 0.0  ;;  %v1424_v50 = vadd.f32 %v1423_v12, %v1422_v57  ;;  %v1429_v27 = vsel %vm701_vm5, %v3502_v29, 0.0  ;;  %v3538_v59 = vld [vmem:[#allocation39_spill] sm:$0xff] }
 0x257   :  { %v693_v36 = vmul.f32 %v3527_v49, %v681_v63  ;;  %v685_v22 = vsub.f32 %v527_v33, %v634_v18  ;;  %v715_v3 = vsel %vm701_vm5, %v696_v28, 0.0  ;;  %v528_v56 = vadd.f32 %v514_v26, %v3535_v38 }
 0x258   :  { %v1781_v23 = vpop.eup %1780  ;;  %v530_v54 = vadd.f32 %v518_v45, %v3537_v60  ;;  %v1426_v63 = vadd.f32 %v1425_v53, %v1424_v50  ;;  %v1435_v33 = vsel %vm701_vm5, %v3095_v46, 0.0 }
 0x259   :  { %v709_v41 = vsel %vm701_vm5, %v693_v36, 0.0  ;;  %v516_v25 = vmul.f32 0.6931472, %v1781_v23  ;;  %v630_v51 = vpop.xlane.xlu1 %629  ;;  %v697_v13 = vmul.f32 %v3536_v52, %v685_v22  ;;  %v3540_v36 = vld [vmem:[#allocation47_spill] sm:$0xff] }
 0x25a   :  { %v683_v19 = vsub.f32 %v525_v16, %v630_v51  ;;  %v710_v0 = vadd.f32 %v709_v41, %v708_v9  ;;  %v1428_v47 = vadd.f32 %v1427_v10, %v1426_v63  ;;  %v1433_v41 = vsel %vm701_vm5, %v3060_v42, 0.0 }
 0x25b   :  { %v529_v30 = vadd.f32 %v516_v25, %v3532_v14  ;;  %v717_v44 = vsel %vm701_vm5, %v697_v13, 0.0 }
 0x25c   :  { %v695_v15 = vmul.f32 %v3533_v39, %v683_v19  ;;  %v712_v61 = vadd.f32 %v711_v32, %v710_v0  ;;  %v1430_v49 = vadd.f32 %v1429_v27, %v1428_v47  ;;  %v760_v19 = vpop.xlane.xlu2 %759 }
 0x25d   :  { %v687_v37 = vsub.f32 %v529_v30, %v638_v48  ;;  %v761_v62 = vrot.slane %v760_v19, 4 }
 0x25e   :  { %v713_v34 = vsel %vm701_vm5, %v695_v15, 0.0  ;;  %v640_v2 = vpop.xlane.xlu0 %639  ;;  %v1432_v20 = vadd.f32 %v1431_v1, %v1430_v49 }
 0x25f   :  { %v714_v40 = vadd.f32 %v713_v34, %v712_v61  ;;  %v688_v24 = vsub.f32 %v530_v54, %v640_v2  ;;  %v699_v6 = vmul.f32 %v3539_v4, %v687_v37  ;;  %v762_v22 = vadd.f32 %v761_v62, %v760_v19 }
 0x260   :  { %v1434_v43 = vadd.f32 %v1433_v41, %v1432_v20 }
 0x261   :  { %v716_v7 = vadd.f32 %v715_v3, %v714_v40  ;;  %v636_v21 = vpop.xlane.xlu1 %635  ;;  %v700_v23 = vmul.f32 %v3540_v36, %v688_v24  ;;  %v721_v9 = vsel %vm701_vm5, %v699_v6, 0.0  ;;  %v763_v15 = vrot.slane %v762_v22, 2 }
 0x262   :  { %v686_v18 = vsub.f32 %v528_v56, %v636_v21  ;;  %v1436_v51 = vadd.f32 %v1435_v33, %v1434_v43 }
 0x263   :  { %v718_v17 = vadd.f32 %v717_v44, %v716_v7  ;;  %v723_v26 = vsel %vm701_vm5, %v700_v23, 0.0  ;;  %v764_v2 = vadd.f32 %v763_v15, %v762_v22 }
 0x264   :  { %v698_v8 = vmul.f32 %v3538_v59, %v686_v18  ;;  %v1182_v0 = vpop.xlane.xlu2 %1181 }
 0x265   :  { %v1183_v45 = vrot.slane %v1182_v0, 4  ;;  %v765_v10 = vrot.slane %v764_v2, 1 }
 0x266   :  { %v719_v35 = vsel %vm701_vm5, %v698_v8, 0.0 }
 0x267   :  { %v720_v16 = vadd.f32 %v719_v35, %v718_v17  ;;  %v1184_v39 = vadd.f32 %v1183_v45, %v1182_v0  ;;  %v766_v59 = vadd.f32 %v765_v10, %v764_v2 }
 0x269   :  { %v722_v29 = vadd.f32 %v721_v9, %v720_v16  ;;  %v1185_v53 = vrot.slane %v1184_v39, 2 }
 0x26a   :  { %v1118_v55 = vpop.xlane.xlu0 %1117 }
 0x26b   :  { %v724_v25 = vadd.f32 %v723_v26, %v722_v29  ;;  %v1119_v11 = vrot.slane %v1118_v55, 4  ;;  %v1186_v52 = vadd.f32 %v1185_v53, %v1184_v39 }
 0x26c   :  { %v1470_v42 = vpop.xlane.xlu2 %1469 }
 0x26d   :  { %725 = vadd.xlane.f32.xlu1 %v724_v25  ;;  %v1120_v14 = vadd.f32 %v1119_v11, %v1118_v55  ;;  %v1471_v61 = vrot.slane %v1470_v42, 4  ;;  %v1187_v47 = vrot.slane %v1186_v52, 1 }
 0x26f   :  { %v1121_v12 = vrot.slane %v1120_v14, 2  ;;  %v1472_v48 = vadd.f32 %v1471_v61, %v1470_v42  ;;  %v1188_v36 = vadd.f32 %v1187_v47, %v1186_v52 }
 0x271   :  { %v1122_v56 = vadd.f32 %v1121_v12, %v1120_v14  ;;  %v1473_v13 = vrot.slane %v1472_v48, 2 }
 0x272   :  { %v1406_v58 = vpop.xlane.xlu0 %1405 }
 0x273   :  { %v1407_v32 = vrot.slane %v1406_v58, 4  ;;  %v1123_v63 = vrot.slane %v1122_v56, 1  ;;  %v1474_v44 = vadd.f32 %v1473_v13, %v1472_v48 }
 0x275   :  { %1437 = vadd.xlane.f32.xlu1 %v1436_v51  ;;  %v1408_v46 = vadd.f32 %v1407_v32, %v1406_v58  ;;  %v1124_v6 = vadd.f32 %v1123_v63, %v1122_v56  ;;  %v1475_v35 = vrot.slane %v1474_v44, 1 }
 0x277   :  { %v1409_v40 = vrot.slane %v1408_v46, 2  ;;  %v1476_v9 = vadd.f32 %v1475_v35, %v1474_v44 }
 0x279   :  { %v1410_v60 = vadd.f32 %v1409_v40, %v1408_v46 }
 0x27b   :  { %v1411_v8 = vrot.slane %v1410_v60, 1 }
 0x27d   :  { %v1412_v23 = vadd.f32 %v1411_v8, %v1410_v60 }
 0x2c0   :  { %v1150_v5 = vpop.xlane.xlu1 %1149 }
 0x2c1   :  { %v1151_v28 = vrot.slane %v1150_v5, 4 }
 0x2c3   :  { %v1152_v30 = vadd.f32 %v1151_v28, %v1150_v5 }
 0x2c5   :  { %v1153_v34 = vrot.slane %v1152_v30, 2 }
 0x2c7   :  { %v1154_v50 = vadd.f32 %v1153_v34, %v1152_v30 }
 0x2c9   :  { %v1155_v24 = vrot.slane %v1154_v50, 1 }
 0x2cb   :  { %v1156_v17 = vadd.f32 %v1155_v24, %v1154_v50 }
 0x2e0   :  { %v726_v31 = vpop.xlane.xlu1 %725 }
 0x2e1   :  { %v727_v57 = vrot.slane %v726_v31, 4 }
 0x2e3   :  { %v728_v3 = vadd.f32 %v727_v57, %v726_v31 }
 0x2e5   :  { %v729_v38 = vrot.slane %v728_v3, 2 }
 0x2e7   :  { %v730_v37 = vadd.f32 %v729_v38, %v728_v3 }
 0x2e8   :  { %v1438_v54 = vpop.xlane.xlu1 %1437 }
 0x2e9   :  { %v1439_v7 = vrot.slane %v1438_v54, 4  ;;  %v731_v21 = vrot.slane %v730_v37, 1 }
 0x2eb   :  { %v1440_v18 = vadd.f32 %v1439_v7, %v1438_v54  ;;  %v732_v27 = vadd.f32 %v731_v21, %v730_v37 }
 0x2ed   :  { %v1441_v4 = vrot.slane %v1440_v18, 2  ;;  %1635 = vpush %v732_v27 }
 0x2ee   :  { %1637 = vpush %v766_v59 }
 0x2ef   :  { %v1442_v49 = vadd.f32 %v1441_v4, %v1440_v18  ;;  %1639 = vpush %v1124_v6 }
 0x2f0   :  { %1641 = vpush %v1156_v17 }
 0x2f1   :  { %1643 = vpush %v1188_v36  ;;  %v1443_v1 = vrot.slane %v1442_v49, 1 }
 0x2f2   :  { %1645 = vpush %v1412_v23 }
 0x2f3   :  { %v1444_v16 = vadd.f32 %v1443_v1, %v1442_v49 }
 0x2f5   :  { %1647 = vpush %v1444_v16 }
 0x2f6   :  { %1649 = vpush %v1476_v9 }
 0x31e   :  { %s1636_s6 = spop %1635 }
 0x31f   :  { %735 = sst [smem:[#allocation2]] %s1636_s6  ;;  %s1638_s0 = spop %1637 }
 0x320   :  { %769 = sst [smem:[#allocation2 + $0x1]] %s1638_s0  ;;  %s1640_s25 = spop %1639 }
 0x321   :  { %1479 = sst [smem:[#allocation2 + $0x2]] %s1640_s25  ;;  %s1642_s26 = spop %1641 }
 0x322   :  { %1481 = sst [smem:[#allocation2 + $0x3]] %s1642_s26  ;;  %s1644_s27 = spop %1643 }
 0x323   :  { %1483 = sst [smem:[#allocation2 + $0x4]] %s1644_s27  ;;  %s1646_s2 = spop %1645 }
 0x324   :  { %1485 = sst [smem:[#allocation2 + $0x5]] %s1646_s2 }
 0x326   :  { %s1648_s28 = spop %1647 }
 0x327   :  { %1487 = sst [smem:[#allocation2 + $0x6]] %s1648_s28  ;;  %s1650_s1 = spop %1649 }
 0x328   :  { %1489 = sst [smem:[#allocation2 + $0x7]] %s1650_s1 }
 0x329   :  { %1498 = dma.smem_to_vmem %s1811_s29, 16, %s1496_s24, [#allocation3]  }
 0x32a   :  { %1806 = dma.done.wait [#allocation3], 16  }
 0x32b   :  { %1807 = vsyncadd [#allocation3], 4294967280 }
 0x32c   :  { %1503 = sfence }
 0x32d   :  { %1504 = vsyncpa [#allocation3], 1 }

</bundles_post_ra>
